<compile_context>
chip_gen: v6e
topology: v6e:2x2x1
jax: 0.10.0
libtpu: 0.0.40
codegen_flags: <defaults>
</compile_context>

<pallas_src>
import math

import numpy as np
import jax
import jax.numpy as jnp
from jax.experimental import pallas as pl
from jax.experimental.pallas import tpu as pltpu

HID_DIM = 128           # gol.conf['hidden'] -- pinned to 128 by self.ffn = MLP(128, 256, 128)
FFN_HID = 256
HEADS = 2               # beh_attn / spa_attn: nn.MultiheadAttention(hid_dim, num_heads=2)
HEAD_DIM = HID_DIM // HEADS
LN_EPS = 1e-8           # nn.LayerNorm(..., eps=1e-08)
NEG_INF = -1e9
INTERVAL = 8            # gol.conf['interval'] (distance_emb / temporal_emb rows)


def _round_up(x, m):
    return (x + m - 1) // m * m


# ----------------------------------------------------------------------------
# In-kernel helpers (traced inside the fused kernel)
# ----------------------------------------------------------------------------
def _layer_norm(x, g, b):
    mu = jnp.mean(x, axis=-1, keepdims=True)
    xc = x - mu
    var = jnp.mean(xc * xc, axis=-1, keepdims=True)
    return xc * jax.lax.rsqrt(var + LN_EPS) * g + b


def _proj(x, w_ref, b_ref):
    # bf16 operands into the MXU, f32 accumulation, f32 bias add.
    return jnp.dot(x.astype(jnp.bfloat16), w_ref[...],
                   preferred_element_type=jnp.float32) + b_ref[...]


def _proj_kv(x, wkv_ref, bkv_ref):
    kv = jnp.dot(x.astype(jnp.bfloat16), wkv_ref[...],
                 preferred_element_type=jnp.float32) + bkv_ref[...]
    return kv[:, :HID_DIM], kv[:, HID_DIM:]          # 128-lane aligned slices


def _mha(q, k, v, bias):
    """Batched scaled dot-product attention on pre-projected q/k/v.

    q: (B, Lq, D), k/v: (B, Lk, D) f32; bias additive, broadcastable to
    (B, Lq, Lk) (0 valid / NEG_INF masked).  Heads are handled via static
    64-lane slices (no swapaxes / relayout)."""
    scale = 1.0 / math.sqrt(HEAD_DIM)
    qb = q.astype(jnp.bfloat16)
    kb = k.astype(jnp.bfloat16)
    vb = v.astype(jnp.bfloat16)
    outs = []
    for h in range(HEADS):                         # statically unrolled (2 heads)
        sl = slice(h * HEAD_DIM, (h + 1) * HEAD_DIM)
        s = jnp.einsum("bqd,bkd->bqk", qb[..., sl], kb[..., sl],
                       preferred_element_type=jnp.float32)
        s = s * scale + bias
        s = s - jnp.max(s, axis=-1, keepdims=True)
        e = jnp.exp(s)
        a = e * pl.reciprocal(jnp.sum(e, axis=-1, keepdims=True), approx=True)
        outs.append(jnp.einsum("bqk,bkd->bqd", a.astype(jnp.bfloat16), vb[..., sl],
                               preferred_element_type=jnp.float32))
    return jnp.concatenate(outs, axis=-1)
    # TODO(synk): attention dropout (p=0.2) is a no-op at inference; omitted.


# ----------------------------------------------------------------------------
# Fused BehaviorGPM + SpatialHGM kernel (BB batch elements per grid step)
# ----------------------------------------------------------------------------
def mpdc_encoder_kernel(
        # per-batch data blocks
        beh_ref, kmask_ref, vmask_ref, wmean_ref, spa_ref, smask_ref,
        # shared weights (full arrays, constant index maps)
        bln_g, bln_b,
        f_w1, f_b1, f_w2, f_b2, prm,
        qf_w, qf_b,
        s_wkv, s_bkv, s_wo, s_bo,
        b_wkv, b_bkv, b_wo, b_bo,
        sln_g, sln_b, saln_g, saln_b,
        # output: pre-summed logits query (beh_encoder_prompt + spa_encoder)
        query_ref):
    bb, lb, d = beh_ref.shape
    ls = spa_ref.shape[1]

    x = beh_ref[...]                                  # (BB, Lb, D) padded behavior embs
    x2 = x.reshape(bb * lb, d)

    # --------------------------- BehaviorGPM --------------------------------
    beh_hid2 = _layer_norm(x2, bln_g[...], bln_b[...])       # beh_layernorm

    # MLP(128,256,128) followed by the elementwise prompt gating
    h = jnp.maximum(_proj(x2, f_w1, f_b1), 0.0)
    cond2 = _proj(h, f_w2, f_b2) * prm[...]

    # fused Q projection: [spa_attn.q | beh_attn.q] from the shared beh_hid
    q_both = _proj(beh_hid2, qf_w, qf_b)                      # (BB*Lb, 2D)
    q_spa = q_both[:, :d].reshape(bb, lb, d)
    q_beh = q_both[:, d:].reshape(bb, lb, d)

    # spa_attn(beh_hid, cond, cond): the reference passes no key_padding_mask,
    # so only the extra 8-row alignment padding (vmask) is masked.
    # (Yes, the reference really uses the *spatial* attention weights here.)
    kp, vp = _proj_kv(cond2, s_wkv, s_bkv)
    ctx_p = _mha(q_spa, kp.reshape(bb, lb, d), vp.reshape(bb, lb, d),
                 vmask_ref[...])
    beh_promt2 = _proj(ctx_p.reshape(bb * lb, d), s_wo, s_bo)

    # beh_attn(beh_hid, beh_promt, beh_promt, key_padding_mask)
    k2, v2 = _proj_kv(beh_promt2, b_wkv, b_bkv)
    ctx2 = _mha(q_beh, k2.reshape(bb, lb, d), v2.reshape(bb, lb, d),
                kmask_ref[...])
    attn2 = _proj(ctx2.reshape(bb * lb, d), b_wo, b_bo)

    # residual add fused with the masked mean (host-precomputed valid/len
    # weights -> a tiny (1,Lb)@(Lb,D) einsum per batch element, no in-kernel
    # length reduction and no divide-by-zero).
    resid = (attn2 + beh_hid2).reshape(bb, lb, d)
    beh_encp = jnp.einsum("bql,bld->bqd", wmean_ref[...], resid,
                          preferred_element_type=jnp.float32)  # (BB, 1, D)
    beh_encp2 = beh_encp.reshape(bb, d)

    # ---------------------------- SpatialHGM --------------------------------
    sx2 = spa_ref[...].reshape(bb * ls, d)
    q1 = _layer_norm(beh_encp2, sln_g[...], sln_b[...])       # spa_layernorm
    q_s = _proj(q1, qf_w, qf_b)[:, :d]                        # spa_attn Q proj
    ks, vs = _proj_kv(sx2, s_wkv, s_bkv)
    ctx_s = _mha(q_s[:, None, :], ks.reshape(bb, ls, d), vs.reshape(bb, ls, d),
                 smask_ref[...])
    spa_out = _proj(ctx_s.reshape(bb, d), s_wo, s_bo)
    spa_enc = _layer_norm(spa_out, saln_g[...], saln_b[...])  # spa_attn_layernorm

    # TODO(synk): with a real SpatialEncoder, spa_embs != poi_emb and the two
    # encodings would have to be emitted separately; here pred_logits collapses
    # to (beh_encp + spa_enc) @ poi_emb.T so one pre-summed query suffices.
    query_ref[...] = (beh_encp2 + spa_enc)[:, None, :]


def _full_spec(shape):
    rank = len(shape)
    return pl.BlockSpec(shape, lambda b: (0,) * rank)


def fused_encoder(beh_pad, beh_kmask, beh_vmask, beh_wmean, spa_pad, spa_kmask,
                  w, bb, n_blocks):
    b_pad, lb, d = beh_pad.shape
    ls = spa_pad.shape[1]

    weights = [
        w["bln_g"], w["bln_b"],
        w["f_w1"], w["f_b1"], w["f_w2"], w["f_b2"], w["prm"],
        w["qf_w"], w["qf_b"],
        w["s_wkv"], w["s_bkv"], w["s_wo"], w["s_bo"],
        w["b_wkv"], w["b_bkv"], w["b_wo"], w["b_bo"],
        w["sln_g"], w["sln_b"], w["saln_g"], w["saln_b"],
    ]
    weight_specs = [_full_spec(x.shape) for x in weights]

    in_specs = [
        pl.BlockSpec((bb, lb, d), lambda b: (b, 0, 0)),   # beh_embs_pad
        pl.BlockSpec((bb, 1, lb), lambda b: (b, 0, 0)),   # key-padding mask
        pl.BlockSpec((1, 1, lb), lambda b: (0, 0, 0)),    # alignment mask (shared)
        pl.BlockSpec((bb, 1, lb), lambda b: (b, 0, 0)),   # masked-mean weights
        pl.BlockSpec((bb, ls, d), lambda b: (b, 0, 0)),   # spa_embs_pad
        pl.BlockSpec((bb, 1, ls), lambda b: (b, 0, 0)),   # spa key-padding mask
    ] + weight_specs

    out_spec = pl.BlockSpec((bb, 1, d), lambda b: (b, 0, 0))
    out_shape = jax.ShapeDtypeStruct((b_pad, 1, d), jnp.float32)

    query = pl.pallas_call(
        mpdc_encoder_kernel,
        grid=(n_blocks,),
        in_specs=in_specs,
        out_specs=out_spec,
        out_shape=out_shape,
        compiler_params=pltpu.CompilerParams(
            dimension_semantics=("parallel",)),   # batch blocks shard over v7x's 2 TCs
    )(beh_pad, beh_kmask, beh_vmask, beh_wmean, spa_pad, spa_kmask, *weights)
    return query[:, 0, :]


# ----------------------------------------------------------------------------
# POI-tiled logits kernel
# ----------------------------------------------------------------------------
def logits_kernel(q_ref, tab_ref, o_ref):
    # (beh_encoder_prompt + spa_encoder) @ poi_emb.T ; the pre-summed query is
    # already bf16, the table is pre-transposed + bf16 (prepared once at init)
    # so the MXU sees lane-dense operands with no in-kernel transpose or cast.
    o_ref[...] = jnp.dot(q_ref[...], tab_ref[...],
                         preferred_element_type=jnp.float32)


def prep_poi_table(poi_emb):
    """Hoisted table prep: transpose to (D, N_pad), bf16 cast, pad once at init."""
    n_poi = poi_emb.shape[0]
    n128 = _round_up(n_poi, 128)
    if n128 <= 256:
        tile_n = n128                                   # tiny vocab: single tile
    else:
        tile_n = min(8192, _round_up((n128 + 1) // 2, 128))   # >= 2 tiles (v7x 2 TCs)
    n_pad = _round_up(n128, tile_n)
    tab = jnp.pad(poi_emb.T.astype(jnp.bfloat16), ((0, 0), (0, n_pad - n_poi)))
    # TODO(synk): on v5e/v6e an int8 table (per-row scales) would halve HBM
    # bytes again; v7x has no int MXU path so it stays bf16 here.
    return tab, tile_n


def pred_logits(query, tab, tile_n, n_poi, bsz):
    d = query.shape[1]
    b8 = _round_up(max(query.shape[0], 8), 8)           # sublane-aligned LHS rows
    q_pad = jnp.pad(query, ((0, b8 - query.shape[0]), (0, 0))).astype(jnp.bfloat16)
    n_pad = tab.shape[1]

    out = pl.pallas_call(
        logits_kernel,
        grid=(n_pad // tile_n,),
        in_specs=[
            pl.BlockSpec((b8, d), lambda j: (0, 0)),
            pl.BlockSpec((d, tile_n), lambda j: (0, j)),
        ],
        out_specs=pl.BlockSpec((b8, tile_n), lambda j: (0, j)),
        out_shape=jax.ShapeDtypeStruct((b8, n_pad), jnp.float32),
        compiler_params=pltpu.CompilerParams(
            dimension_semantics=("parallel",)),
    )(q_pad, tab)
    return out[:bsz, :n_poi]


# ----------------------------------------------------------------------------
# Parameter init (deterministic, synthetic) + one-time inference prep
# ----------------------------------------------------------------------------
def xavier_normal(key, shape):
    std = (2.0 / (shape[0] + shape[1])) ** 0.5
    return std * jax.random.normal(key, shape, dtype=jnp.float32)


def xavier_uniform(key, shape):
    bound = (6.0 / (shape[0] + shape[1])) ** 0.5
    return jax.random.uniform(key, shape, jnp.float32, -bound, bound)


def init_mha_params(key):
    d = HID_DIM
    ks = jax.random.split(key, 3)
    # stored pre-transposed (in, out); K/V projections fused into one block.
    return {
        "wq": xavier_uniform(ks[0], (d, d)),
        "wkv": xavier_uniform(ks[1], (d, 2 * d)),
        "bq": jnp.zeros((1, d), jnp.float32),
        "bkv": jnp.zeros((1, 2 * d), jnp.float32),
        "wo": xavier_uniform(ks[2], (d, d)),
        "bo": jnp.zeros((1, d), jnp.float32),
    }


def init_params(key, n_poi):
    d = HID_DIM
    ks = jax.random.split(key, 8)
    ln = lambda: {"g": jnp.ones((1, d), jnp.float32),
                  "b": jnp.zeros((1, d), jnp.float32)}
    return {
        "poi_emb": xavier_normal(ks[0], (n_poi, d)),
        # TODO(synk): distance_emb / temporal_emb are only consumed by BehCn,
        # which is not defined in the reference; kept for shape fidelity only.
        "distance_emb": xavier_normal(ks[1], (INTERVAL, d)),
        "temporal_emb": xavier_normal(ks[2], (INTERVAL, d)),
        "ffn": {
            "w1": xavier_uniform(ks[3], (d, FFN_HID)),   # (in, out)
            "b1": jnp.zeros((1, FFN_HID), jnp.float32),
            "w2": xavier_uniform(ks[4], (FFN_HID, d)),
            "b2": jnp.zeros((1, d), jnp.float32),
            "prompt": xavier_uniform(ks[5], (1, d)),
        },
        "beh_ln": ln(), "spa_ln": ln(), "spa_attn_ln": ln(),
        "beh_attn": init_mha_params(ks[6]),
        "spa_attn": init_mha_params(ks[7]),
    }


def prepare_inference_params(p):
    """One-time prep: bf16 matmul weights, fused Q projection, prepped POI table."""
    spa, beh = p["spa_attn"], p["beh_attn"]
    bf = lambda w: w.astype(jnp.bfloat16)
    tab, tile_n = prep_poi_table(p["poi_emb"])
    weights = {
        "bln_g": p["beh_ln"]["g"], "bln_b": p["beh_ln"]["b"],
        "f_w1": bf(p["ffn"]["w1"]), "f_b1": p["ffn"]["b1"],
        "f_w2": bf(p["ffn"]["w2"]), "f_b2": p["ffn"]["b2"],
        "prm": p["ffn"]["prompt"],
        # fused [spa_attn.q | beh_attn.q] projection from the shared beh_hid
        "qf_w": jnp.concatenate([spa["wq"], beh["wq"]], axis=1).astype(jnp.bfloat16),
        "qf_b": jnp.concatenate([spa["bq"], beh["bq"]], axis=1),
        "s_wkv": bf(spa["wkv"]), "s_bkv": spa["bkv"],
        "s_wo": bf(spa["wo"]), "s_bo": spa["bo"],
        "b_wkv": bf(beh["wkv"]), "b_bkv": beh["bkv"],
        "b_wo": bf(beh["wo"]), "b_bo": beh["bo"],
        "sln_g": p["spa_ln"]["g"], "sln_b": p["spa_ln"]["b"],
        "saln_g": p["spa_attn_ln"]["g"], "saln_b": p["spa_attn_ln"]["b"],
    }
    return {"poi_emb": p["poi_emb"], "poi_tab": tab, "tile_n": tile_n,
            "n_poi": int(p["poi_emb"].shape[0]), "weights": weights}


# ----------------------------------------------------------------------------
# Forward-pass glue (pad_sequence / gather / mask building)
# ----------------------------------------------------------------------------
def _batch_blocking(bsz):
    n_blocks = 2 if bsz >= 2 else 1       # keep grid >= 2 so v7x uses both TCs
    bb = -(-bsz // n_blocks)
    return bb, n_blocks, bb * n_blocks


def gather_and_pad(embs, idx_list, max_len, b_pad):
    """One vectorized gather; rows >= len(idx_list) stay zero (batch padding)."""
    idx = np.zeros((b_pad, max_len), dtype=np.int32)
    valid = np.zeros((b_pad, max_len), dtype=np.float32)
    for i, ix in enumerate(idx_list):
        n = int(ix.shape[0])
        idx[i, :n] = np.asarray(ix, dtype=np.int32)
        valid[i, :n] = 1.0
    valid_j = jnp.asarray(valid)
    padded = jnp.take(embs, jnp.asarray(idx), axis=0) * valid_j[:, :, None]
    return padded, valid


def mpdc_forward(prep, seqs, beh_nodes):
    poi_embs = prep["poi_emb"]
    bsz = len(beh_nodes)
    bb, n_blocks, b_pad = _batch_blocking(bsz)
    # TODO(synk): nn.Dropout paths are inference no-ops and are omitted.

    # ------------------------- BehaviorGPM inputs ---------------------------
    # TODO(synk): BehCn (behavior-graph encoder over (poi, distance, temporal)
    # embeddings) is not defined in the reference; stand-in per-node embedding
    # is poi_emb[node_id].
    beh_lengths = [int(n.shape[0]) for n in beh_nodes]
    lb_orig = max(beh_lengths)
    lb = max(_round_up(lb_orig, 8), 8)            # (8,128)-aligned sublane count
    beh_pad, beh_valid = gather_and_pad(poi_embs, beh_nodes, lb, b_pad)

    # ------------------------- SpatialHGM inputs ----------------------------
    # TODO(synk): SpatialEncoder.encode (Hyperboloid expmap0/proj, Lorentz
    # logmap0, SpaCn graph convolutions) depends on external libraries not in
    # the reference; spa_embs falls back to the raw poi embeddings.
    seq_lengths = [int(s.shape[0]) for s in seqs]
    ls = max(_round_up(max(seq_lengths), 8), 8)
    spa_pad, spa_valid = gather_and_pad(poi_embs, seqs, ls, b_pad)

    beh_kmask = jnp.asarray(np.where(beh_valid > 0, 0.0, NEG_INF),
                            jnp.float32)[:, None, :]
    spa_kmask = jnp.asarray(np.where(spa_valid > 0, 0.0, NEG_INF),
                            jnp.float32)[:, None, :]
    # the prompt attention has no key_padding_mask in the reference -> only the
    # extra 8-row alignment padding (cols >= lb_orig) is masked for it.
    beh_vmask = jnp.asarray(np.where(np.arange(lb) < lb_orig, 0.0, NEG_INF),
                            jnp.float32)[None, None, :]
    # host-precomputed masked-mean weights (valid / length), guarded vs len==0
    lens = np.maximum(beh_valid.sum(axis=1, keepdims=True), 1.0)
    beh_wmean = jnp.asarray(beh_valid / lens, jnp.float32)[:, None, :]

    query = fused_encoder(beh_pad, beh_kmask, beh_vmask, beh_wmean,
                          spa_pad, spa_kmask, prep["weights"], bb, n_blocks)

    # TODO(synk): VP_SDE.reverse_sde (sde_sample) is not defined in the
    # reference and its output is not used in pred_logits; skipped.  The
    # beh_encoder (non-prompt) branch only feeds that path, so it was removed.

    # spa_embs is the same table as poi_emb here, so pred_logits collapses to
    # (beh_encoder_prompt + spa_encoder) @ poi_emb.T with the table read once.
    return pred_logits(query, prep["poi_tab"], prep["tile_n"],
                       prep["n_poi"], bsz)


# ----------------------------------------------------------------------------
if __name__ == "__main__":
    key = jax.random.PRNGKey(0)
    k_param, k_s1, k_s2, k_b1, k_b2 = jax.random.split(key, 5)

    n_user, n_poi = 8, 512
    params = init_params(k_param, n_poi)
    prep = prepare_inference_params(params)

    # variable-length POI check-in sequences (seqs) and behavior-graph node
    # lists (one per batch element, as implied by beh_graph.batch / bincount)
    seqs = [
        jax.random.randint(k_s1, (5,), 0, n_poi),
        jax.random.randint(k_s2, (8,), 0, n_poi),
    ]
    beh_nodes = [
        jax.random.randint(k_b1, (6,), 0, n_poi),
        jax.random.randint(k_b2, (4,), 0, n_poi),
    ]

    logits = mpdc_forward(prep, seqs, beh_nodes)
    logits = jax.block_until_ready(logits)
    assert logits.shape == (2, n_poi)
    assert bool(jnp.all(jnp.isfinite(logits)))
    print("KERNEL_OK")
</pallas_src>

<mosaic_0001>
module attributes {stable_mosaic.version = 11 : i64} {
  func.func @mpdc_encoder_kernel(%arg0: i32, %arg1: memref<1x8x128xf32, #tpu.memory_space<vmem>>, %arg2: memref<1x1x8xf32, #tpu.memory_space<vmem>>, %arg3: memref<1x1x8xf32, #tpu.memory_space<vmem>>, %arg4: memref<1x1x8xf32, #tpu.memory_space<vmem>>, %arg5: memref<1x8x128xf32, #tpu.memory_space<vmem>>, %arg6: memref<1x1x8xf32, #tpu.memory_space<vmem>>, %arg7: memref<1x128xf32, #tpu.memory_space<vmem>>, %arg8: memref<1x128xf32, #tpu.memory_space<vmem>>, %arg9: memref<128x256xbf16, #tpu.memory_space<vmem>>, %arg10: memref<1x256xf32, #tpu.memory_space<vmem>>, %arg11: memref<256x128xbf16, #tpu.memory_space<vmem>>, %arg12: memref<1x128xf32, #tpu.memory_space<vmem>>, %arg13: memref<1x128xf32, #tpu.memory_space<vmem>>, %arg14: memref<128x256xbf16, #tpu.memory_space<vmem>>, %arg15: memref<1x256xf32, #tpu.memory_space<vmem>>, %arg16: memref<128x256xbf16, #tpu.memory_space<vmem>>, %arg17: memref<1x256xf32, #tpu.memory_space<vmem>>, %arg18: memref<128x128xbf16, #tpu.memory_space<vmem>>, %arg19: memref<1x128xf32, #tpu.memory_space<vmem>>, %arg20: memref<128x256xbf16, #tpu.memory_space<vmem>>, %arg21: memref<1x256xf32, #tpu.memory_space<vmem>>, %arg22: memref<128x128xbf16, #tpu.memory_space<vmem>>, %arg23: memref<1x128xf32, #tpu.memory_space<vmem>>, %arg24: memref<1x128xf32, #tpu.memory_space<vmem>>, %arg25: memref<1x128xf32, #tpu.memory_space<vmem>>, %arg26: memref<1x128xf32, #tpu.memory_space<vmem>>, %arg27: memref<1x128xf32, #tpu.memory_space<vmem>>, %arg28: memref<1x1x128xf32, #tpu.memory_space<vmem>>) attributes {dimension_semantics = [#tpu.dimension_semantics<parallel>], iteration_bounds = array<i64: 2>, scalar_prefetch = 0 : i64, scratch_operands = 0 : i64, tpu.core_type = #tpu.core_type<tc>, window_params = [{transform_indices = @transform_0, window_bounds = array<i64: 1, 8, 128>}, {transform_indices = @transform_1, window_bounds = array<i64: 1, 1, 8>}, {pipeline_mode = #tpu.pipeline_mode<synchronous>, transform_indices = @transform_2, window_bounds = array<i64: 1, 1, 8>}, {transform_indices = @transform_3, window_bounds = array<i64: 1, 1, 8>}, {transform_indices = @transform_4, window_bounds = array<i64: 1, 8, 128>}, {transform_indices = @transform_5, window_bounds = array<i64: 1, 1, 8>}, {pipeline_mode = #tpu.pipeline_mode<synchronous>, transform_indices = @transform_6, window_bounds = array<i64: 1, 128>}, {pipeline_mode = #tpu.pipeline_mode<synchronous>, transform_indices = @transform_7, window_bounds = array<i64: 1, 128>}, {pipeline_mode = #tpu.pipeline_mode<synchronous>, transform_indices = @transform_8, window_bounds = array<i64: 128, 256>}, {pipeline_mode = #tpu.pipeline_mode<synchronous>, transform_indices = @transform_9, window_bounds = array<i64: 1, 256>}, {pipeline_mode = #tpu.pipeline_mode<synchronous>, transform_indices = @transform_10, window_bounds = array<i64: 256, 128>}, {pipeline_mode = #tpu.pipeline_mode<synchronous>, transform_indices = @transform_11, window_bounds = array<i64: 1, 128>}, {pipeline_mode = #tpu.pipeline_mode<synchronous>, transform_indices = @transform_12, window_bounds = array<i64: 1, 128>}, {pipeline_mode = #tpu.pipeline_mode<synchronous>, transform_indices = @transform_13, window_bounds = array<i64: 128, 256>}, {pipeline_mode = #tpu.pipeline_mode<synchronous>, transform_indices = @transform_14, window_bounds = array<i64: 1, 256>}, {pipeline_mode = #tpu.pipeline_mode<synchronous>, transform_indices = @transform_15, window_bounds = array<i64: 128, 256>}, {pipeline_mode = #tpu.pipeline_mode<synchronous>, transform_indices = @transform_16, window_bounds = array<i64: 1, 256>}, {pipeline_mode = #tpu.pipeline_mode<synchronous>, transform_indices = @transform_17, window_bounds = array<i64: 128, 128>}, {pipeline_mode = #tpu.pipeline_mode<synchronous>, transform_indices = @transform_18, window_bounds = array<i64: 1, 128>}, {pipeline_mode = #tpu.pipeline_mode<synchronous>, transform_indices = @transform_19, window_bounds = array<i64: 128, 256>}, {pipeline_mode = #tpu.pipeline_mode<synchronous>, transform_indices = @transform_20, window_bounds = array<i64: 1, 256>}, {pipeline_mode = #tpu.pipeline_mode<synchronous>, transform_indices = @transform_21, window_bounds = array<i64: 128, 128>}, {pipeline_mode = #tpu.pipeline_mode<synchronous>, transform_indices = @transform_22, window_bounds = array<i64: 1, 128>}, {pipeline_mode = #tpu.pipeline_mode<synchronous>, transform_indices = @transform_23, window_bounds = array<i64: 1, 128>}, {pipeline_mode = #tpu.pipeline_mode<synchronous>, transform_indices = @transform_24, window_bounds = array<i64: 1, 128>}, {pipeline_mode = #tpu.pipeline_mode<synchronous>, transform_indices = @transform_25, window_bounds = array<i64: 1, 128>}, {pipeline_mode = #tpu.pipeline_mode<synchronous>, transform_indices = @transform_26, window_bounds = array<i64: 1, 128>}, {transform_indices = @transform_27, window_bounds = array<i64: 1, 1, 128>}]} {
    %c0 = arith.constant 0 : index
    %c0_0 = arith.constant 0 : index
    %c0_1 = arith.constant 0 : index
    %0 = vector.load %arg1[%c0, %c0_0, %c0_1] : memref<1x8x128xf32, #tpu.memory_space<vmem>>, vector<1x8x128xf32>
    %1 = vector.shape_cast %0 : vector<1x8x128xf32> to vector<8x128xf32>
    %c0_2 = arith.constant 0 : index
    %c0_3 = arith.constant 0 : index
    %2 = vector.load %arg7[%c0_2, %c0_3] : memref<1x128xf32, #tpu.memory_space<vmem>>, vector<1x128xf32>
    %c0_4 = arith.constant 0 : index
    %c0_5 = arith.constant 0 : index
    %3 = vector.load %arg8[%c0_4, %c0_5] : memref<1x128xf32, #tpu.memory_space<vmem>>, vector<1x128xf32>
    %cst = arith.constant dense<0.000000e+00> : vector<8xf32>
    %4 = vector.multi_reduction <add>, %1, %cst [1] : vector<8x128xf32> to vector<8xf32>
    %5 = vector.shape_cast %4 : vector<8xf32> to vector<8x1xf32>
    %cst_6 = arith.constant 1.280000e+02 : f32
    %6 = vector.broadcast %cst_6 : f32 to vector<8x1xf32>
    %7 = arith.divf %5, %6 : vector<8x1xf32>
    %8 = vector.broadcast %7 : vector<8x1xf32> to vector<8x128xf32>
    %9 = arith.subf %1, %8 : vector<8x128xf32>
    %10 = arith.mulf %9, %9 : vector<8x128xf32>
    %cst_7 = arith.constant dense<0.000000e+00> : vector<8xf32>
    %11 = vector.multi_reduction <add>, %10, %cst_7 [1] : vector<8x128xf32> to vector<8xf32>
    %12 = vector.shape_cast %11 : vector<8xf32> to vector<8x1xf32>
    %cst_8 = arith.constant 1.280000e+02 : f32
    %13 = vector.broadcast %cst_8 : f32 to vector<8x1xf32>
    %14 = arith.divf %12, %13 : vector<8x1xf32>
    %cst_9 = arith.constant 9.99999993E-9 : f32
    %15 = vector.broadcast %cst_9 : f32 to vector<8x1xf32>
    %16 = arith.addf %14, %15 : vector<8x1xf32>
    %17 = math.rsqrt %16 : vector<8x1xf32>
    %18 = vector.broadcast %17 : vector<8x1xf32> to vector<8x128xf32>
    %19 = arith.mulf %9, %18 : vector<8x128xf32>
    %20 = vector.broadcast %2 : vector<1x128xf32> to vector<8x128xf32>
    %21 = arith.mulf %19, %20 : vector<8x128xf32>
    %22 = vector.broadcast %3 : vector<1x128xf32> to vector<8x128xf32>
    %23 = arith.addf %21, %22 : vector<8x128xf32>
    %24 = arith.truncf %1 : vector<8x128xf32> to vector<8x128xbf16>
    %c0_10 = arith.constant 0 : index
    %c0_11 = arith.constant 0 : index
    %25 = vector.load %arg9[%c0_10, %c0_11] : memref<128x256xbf16, #tpu.memory_space<vmem>>, vector<128x256xbf16>
    %cst_12 = arith.constant dense<0.000000e+00> : vector<8x256xf32>
    %26 = tpu.matmul %24, %25, %cst_12 {dimension_numbers = #tpu.dot_dimension_numbers<[1], [0], [0], [1], [0, 0, 1, 1], [], []>} : vector<8x128xbf16>, vector<128x256xbf16>, vector<8x256xf32> -> vector<8x256xf32>
    %c0_13 = arith.constant 0 : index
    %c0_14 = arith.constant 0 : index
    %27 = vector.load %arg10[%c0_13, %c0_14] : memref<1x256xf32, #tpu.memory_space<vmem>>, vector<1x256xf32>
    %28 = vector.broadcast %27 : vector<1x256xf32> to vector<8x256xf32>
    %29 = arith.addf %26, %28 : vector<8x256xf32>
    %cst_15 = arith.constant 0.000000e+00 : f32
    %30 = vector.broadcast %cst_15 : f32 to vector<8x256xf32>
    %31 = arith.maximumf %29, %30 : vector<8x256xf32>
    %32 = arith.truncf %31 : vector<8x256xf32> to vector<8x256xbf16>
    %c0_16 = arith.constant 0 : index
    %c0_17 = arith.constant 0 : index
    %33 = vector.load %arg11[%c0_16, %c0_17] : memref<256x128xbf16, #tpu.memory_space<vmem>>, vector<256x128xbf16>
    %cst_18 = arith.constant dense<0.000000e+00> : vector<8x128xf32>
    %34 = tpu.matmul %32, %33, %cst_18 {dimension_numbers = #tpu.dot_dimension_numbers<[1], [0], [0], [1], [0, 0, 1, 1], [], []>} : vector<8x256xbf16>, vector<256x128xbf16>, vector<8x128xf32> -> vector<8x128xf32>
    %c0_19 = arith.constant 0 : index
    %c0_20 = arith.constant 0 : index
    %35 = vector.load %arg12[%c0_19, %c0_20] : memref<1x128xf32, #tpu.memory_space<vmem>>, vector<1x128xf32>
    %36 = vector.broadcast %35 : vector<1x128xf32> to vector<8x128xf32>
    %37 = arith.addf %34, %36 : vector<8x128xf32>
    %c0_21 = arith.constant 0 : index
    %c0_22 = arith.constant 0 : index
    %38 = vector.load %arg13[%c0_21, %c0_22] : memref<1x128xf32, #tpu.memory_space<vmem>>, vector<1x128xf32>
    %39 = vector.broadcast %38 : vector<1x128xf32> to vector<8x128xf32>
    %40 = arith.mulf %37, %39 : vector<8x128xf32>
    %41 = arith.truncf %23 : vector<8x128xf32> to vector<8x128xbf16>
    %c0_23 = arith.constant 0 : index
    %c0_24 = arith.constant 0 : index
    %42 = vector.load %arg14[%c0_23, %c0_24] : memref<128x256xbf16, #tpu.memory_space<vmem>>, vector<128x256xbf16>
    %cst_25 = arith.constant dense<0.000000e+00> : vector<8x256xf32>
    %43 = tpu.matmul %41, %42, %cst_25 {dimension_numbers = #tpu.dot_dimension_numbers<[1], [0], [0], [1], [0, 0, 1, 1], [], []>} : vector<8x128xbf16>, vector<128x256xbf16>, vector<8x256xf32> -> vector<8x256xf32>
    %c0_26 = arith.constant 0 : index
    %c0_27 = arith.constant 0 : index
    %44 = vector.load %arg15[%c0_26, %c0_27] : memref<1x256xf32, #tpu.memory_space<vmem>>, vector<1x256xf32>
    %45 = vector.broadcast %44 : vector<1x256xf32> to vector<8x256xf32>
    %46 = arith.addf %43, %45 : vector<8x256xf32>
    %47 = vector.extract_strided_slice %46 {offsets = [0, 0], sizes = [8, 128], strides = [1, 1]} : vector<8x256xf32> to vector<8x128xf32>
    %48 = vector.shape_cast %47 : vector<8x128xf32> to vector<1x8x128xf32>
    %49 = vector.extract_strided_slice %46 {offsets = [0, 128], sizes = [8, 128], strides = [1, 1]} : vector<8x256xf32> to vector<8x128xf32>
    %50 = vector.shape_cast %49 : vector<8x128xf32> to vector<1x8x128xf32>
    %51 = arith.truncf %40 : vector<8x128xf32> to vector<8x128xbf16>
    %c0_28 = arith.constant 0 : index
    %c0_29 = arith.constant 0 : index
    %52 = vector.load %arg16[%c0_28, %c0_29] : memref<128x256xbf16, #tpu.memory_space<vmem>>, vector<128x256xbf16>
    %cst_30 = arith.constant dense<0.000000e+00> : vector<8x256xf32>
    %53 = tpu.matmul %51, %52, %cst_30 {dimension_numbers = #tpu.dot_dimension_numbers<[1], [0], [0], [1], [0, 0, 1, 1], [], []>} : vector<8x128xbf16>, vector<128x256xbf16>, vector<8x256xf32> -> vector<8x256xf32>
    %c0_31 = arith.constant 0 : index
    %c0_32 = arith.constant 0 : index
    %54 = vector.load %arg17[%c0_31, %c0_32] : memref<1x256xf32, #tpu.memory_space<vmem>>, vector<1x256xf32>
    %55 = vector.broadcast %54 : vector<1x256xf32> to vector<8x256xf32>
    %56 = arith.addf %53, %55 : vector<8x256xf32>
    %57 = vector.extract_strided_slice %56 {offsets = [0, 0], sizes = [8, 128], strides = [1, 1]} : vector<8x256xf32> to vector<8x128xf32>
    %58 = vector.extract_strided_slice %56 {offsets = [0, 128], sizes = [8, 128], strides = [1, 1]} : vector<8x256xf32> to vector<8x128xf32>
    %59 = vector.shape_cast %57 : vector<8x128xf32> to vector<1x8x128xf32>
    %60 = vector.shape_cast %58 : vector<8x128xf32> to vector<1x8x128xf32>
    %c0_33 = arith.constant 0 : index
    %c0_34 = arith.constant 0 : index
    %c0_35 = arith.constant 0 : index
    %61 = vector.load %arg3[%c0_33, %c0_34, %c0_35] : memref<1x1x8xf32, #tpu.memory_space<vmem>>, vector<1x1x8xf32>
    %62 = arith.truncf %48 : vector<1x8x128xf32> to vector<1x8x128xbf16>
    %63 = arith.truncf %59 : vector<1x8x128xf32> to vector<1x8x128xbf16>
    %64 = arith.truncf %60 : vector<1x8x128xf32> to vector<1x8x128xbf16>
    %65 = vector.extract_strided_slice %62 {offsets = [0, 0, 0], sizes = [1, 8, 64], strides = [1, 1, 1]} : vector<1x8x128xbf16> to vector<1x8x64xbf16>
    %66 = vector.extract_strided_slice %63 {offsets = [0, 0, 0], sizes = [1, 8, 64], strides = [1, 1, 1]} : vector<1x8x128xbf16> to vector<1x8x64xbf16>
    "tpu.trace_start"() <{level = 10 : i32, message = "bqd,bkd->bqk"}> : () -> ()
    %cst_36 = arith.constant dense<0.000000e+00> : vector<1x8x8xf32>
    %67 = tpu.matmul %65, %66, %cst_36 {dimension_numbers = #tpu.dot_dimension_numbers<[2], [2], [1], [1], [0, 0, 0, 1, 1, 1], [0], [0]>} : vector<1x8x64xbf16>, vector<1x8x64xbf16>, vector<1x8x8xf32> -> vector<1x8x8xf32>
    "tpu.trace_stop"() : () -> ()
    %cst_37 = arith.constant 1.250000e-01 : f32
    %68 = vector.broadcast %cst_37 : f32 to vector<1x8x8xf32>
    %69 = arith.mulf %67, %68 : vector<1x8x8xf32>
    %70 = vector.broadcast %61 : vector<1x1x8xf32> to vector<1x8x8xf32>
    %71 = arith.addf %69, %70 : vector<1x8x8xf32>
    %cst_38 = arith.constant dense<0xFF800000> : vector<1x8xf32>
    %72 = vector.multi_reduction <maximumf>, %71, %cst_38 [2] : vector<1x8x8xf32> to vector<1x8xf32>
    %73 = vector.shape_cast %72 : vector<1x8xf32> to vector<1x8x1xf32>
    %74 = vector.broadcast %73 : vector<1x8x1xf32> to vector<1x8x8xf32>
    %75 = arith.subf %71, %74 : vector<1x8x8xf32>
    %76 = math.exp %75 : vector<1x8x8xf32>
    %cst_39 = arith.constant dense<0.000000e+00> : vector<1x8xf32>
    %77 = vector.multi_reduction <add>, %76, %cst_39 [2] : vector<1x8x8xf32> to vector<1x8xf32>
    %78 = vector.shape_cast %77 : vector<1x8xf32> to vector<1x8x1xf32>
    %79 = tpu.reciprocal %78 {approx = true} : vector<1x8x1xf32> -> vector<1x8x1xf32>
    %80 = vector.broadcast %79 : vector<1x8x1xf32> to vector<1x8x8xf32>
    %81 = arith.mulf %76, %80 : vector<1x8x8xf32>
    %82 = arith.truncf %81 : vector<1x8x8xf32> to vector<1x8x8xbf16>
    %83 = vector.extract_strided_slice %64 {offsets = [0, 0, 0], sizes = [1, 8, 64], strides = [1, 1, 1]} : vector<1x8x128xbf16> to vector<1x8x64xbf16>
    "tpu.trace_start"() <{level = 10 : i32, message = "bqk,bkd->bqd"}> : () -> ()
    %cst_40 = arith.constant dense<0.000000e+00> : vector<1x8x64xf32>
    %84 = tpu.matmul %82, %83, %cst_40 {dimension_numbers = #tpu.dot_dimension_numbers<[2], [1], [1], [2], [0, 0, 0, 1, 1, 2], [0], [0]>} : vector<1x8x8xbf16>, vector<1x8x64xbf16>, vector<1x8x64xf32> -> vector<1x8x64xf32>
    "tpu.trace_stop"() : () -> ()
    %85 = vector.extract_strided_slice %62 {offsets = [0, 0, 64], sizes = [1, 8, 64], strides = [1, 1, 1]} : vector<1x8x128xbf16> to vector<1x8x64xbf16>
    %86 = vector.extract_strided_slice %63 {offsets = [0, 0, 64], sizes = [1, 8, 64], strides = [1, 1, 1]} : vector<1x8x128xbf16> to vector<1x8x64xbf16>
    "tpu.trace_start"() <{level = 10 : i32, message = "bqd,bkd->bqk"}> : () -> ()
    %cst_41 = arith.constant dense<0.000000e+00> : vector<1x8x8xf32>
    %87 = tpu.matmul %85, %86, %cst_41 {dimension_numbers = #tpu.dot_dimension_numbers<[2], [2], [1], [1], [0, 0, 0, 1, 1, 1], [0], [0]>} : vector<1x8x64xbf16>, vector<1x8x64xbf16>, vector<1x8x8xf32> -> vector<1x8x8xf32>
    "tpu.trace_stop"() : () -> ()
    %cst_42 = arith.constant 1.250000e-01 : f32
    %88 = vector.broadcast %cst_42 : f32 to vector<1x8x8xf32>
    %89 = arith.mulf %87, %88 : vector<1x8x8xf32>
    %90 = vector.broadcast %61 : vector<1x1x8xf32> to vector<1x8x8xf32>
    %91 = arith.addf %89, %90 : vector<1x8x8xf32>
    %cst_43 = arith.constant dense<0xFF800000> : vector<1x8xf32>
    %92 = vector.multi_reduction <maximumf>, %91, %cst_43 [2] : vector<1x8x8xf32> to vector<1x8xf32>
    %93 = vector.shape_cast %92 : vector<1x8xf32> to vector<1x8x1xf32>
    %94 = vector.broadcast %93 : vector<1x8x1xf32> to vector<1x8x8xf32>
    %95 = arith.subf %91, %94 : vector<1x8x8xf32>
    %96 = math.exp %95 : vector<1x8x8xf32>
    %cst_44 = arith.constant dense<0.000000e+00> : vector<1x8xf32>
    %97 = vector.multi_reduction <add>, %96, %cst_44 [2] : vector<1x8x8xf32> to vector<1x8xf32>
    %98 = vector.shape_cast %97 : vector<1x8xf32> to vector<1x8x1xf32>
    %99 = tpu.reciprocal %98 {approx = true} : vector<1x8x1xf32> -> vector<1x8x1xf32>
    %100 = vector.broadcast %99 : vector<1x8x1xf32> to vector<1x8x8xf32>
    %101 = arith.mulf %96, %100 : vector<1x8x8xf32>
    %102 = arith.truncf %101 : vector<1x8x8xf32> to vector<1x8x8xbf16>
    %103 = vector.extract_strided_slice %64 {offsets = [0, 0, 64], sizes = [1, 8, 64], strides = [1, 1, 1]} : vector<1x8x128xbf16> to vector<1x8x64xbf16>
    "tpu.trace_start"() <{level = 10 : i32, message = "bqk,bkd->bqd"}> : () -> ()
    %cst_45 = arith.constant dense<0.000000e+00> : vector<1x8x64xf32>
    %104 = tpu.matmul %102, %103, %cst_45 {dimension_numbers = #tpu.dot_dimension_numbers<[2], [1], [1], [2], [0, 0, 0, 1, 1, 2], [0], [0]>} : vector<1x8x8xbf16>, vector<1x8x64xbf16>, vector<1x8x64xf32> -> vector<1x8x64xf32>
    "tpu.trace_stop"() : () -> ()
    %105 = tpu.concatenate %84, %104 in 2 : vector<1x8x64xf32>, vector<1x8x64xf32> -> vector<1x8x128xf32>
    %106 = vector.shape_cast %105 : vector<1x8x128xf32> to vector<8x128xf32>
    %107 = arith.truncf %106 : vector<8x128xf32> to vector<8x128xbf16>
    %c0_46 = arith.constant 0 : index
    %c0_47 = arith.constant 0 : index
    %108 = vector.load %arg18[%c0_46, %c0_47] : memref<128x128xbf16, #tpu.memory_space<vmem>>, vector<128x128xbf16>
    %cst_48 = arith.constant dense<0.000000e+00> : vector<8x128xf32>
    %109 = tpu.matmul %107, %108, %cst_48 {dimension_numbers = #tpu.dot_dimension_numbers<[1], [0], [0], [1], [0, 0, 1, 1], [], []>} : vector<8x128xbf16>, vector<128x128xbf16>, vector<8x128xf32> -> vector<8x128xf32>
    %c0_49 = arith.constant 0 : index
    %c0_50 = arith.constant 0 : index
    %110 = vector.load %arg19[%c0_49, %c0_50] : memref<1x128xf32, #tpu.memory_space<vmem>>, vector<1x128xf32>
    %111 = vector.broadcast %110 : vector<1x128xf32> to vector<8x128xf32>
    %112 = arith.addf %109, %111 : vector<8x128xf32>
    %113 = arith.truncf %112 : vector<8x128xf32> to vector<8x128xbf16>
    %c0_51 = arith.constant 0 : index
    %c0_52 = arith.constant 0 : index
    %114 = vector.load %arg20[%c0_51, %c0_52] : memref<128x256xbf16, #tpu.memory_space<vmem>>, vector<128x256xbf16>
    %cst_53 = arith.constant dense<0.000000e+00> : vector<8x256xf32>
    %115 = tpu.matmul %113, %114, %cst_53 {dimension_numbers = #tpu.dot_dimension_numbers<[1], [0], [0], [1], [0, 0, 1, 1], [], []>} : vector<8x128xbf16>, vector<128x256xbf16>, vector<8x256xf32> -> vector<8x256xf32>
    %c0_54 = arith.constant 0 : index
    %c0_55 = arith.constant 0 : index
    %116 = vector.load %arg21[%c0_54, %c0_55] : memref<1x256xf32, #tpu.memory_space<vmem>>, vector<1x256xf32>
    %117 = vector.broadcast %116 : vector<1x256xf32> to vector<8x256xf32>
    %118 = arith.addf %115, %117 : vector<8x256xf32>
    %119 = vector.extract_strided_slice %118 {offsets = [0, 0], sizes = [8, 128], strides = [1, 1]} : vector<8x256xf32> to vector<8x128xf32>
    %120 = vector.extract_strided_slice %118 {offsets = [0, 128], sizes = [8, 128], strides = [1, 1]} : vector<8x256xf32> to vector<8x128xf32>
    %121 = vector.shape_cast %119 : vector<8x128xf32> to vector<1x8x128xf32>
    %122 = vector.shape_cast %120 : vector<8x128xf32> to vector<1x8x128xf32>
    %c0_56 = arith.constant 0 : index
    %c0_57 = arith.constant 0 : index
    %c0_58 = arith.constant 0 : index
    %123 = vector.load %arg2[%c0_56, %c0_57, %c0_58] : memref<1x1x8xf32, #tpu.memory_space<vmem>>, vector<1x1x8xf32>
    %124 = arith.truncf %50 : vector<1x8x128xf32> to vector<1x8x128xbf16>
    %125 = arith.truncf %121 : vector<1x8x128xf32> to vector<1x8x128xbf16>
    %126 = arith.truncf %122 : vector<1x8x128xf32> to vector<1x8x128xbf16>
    %127 = vector.extract_strided_slice %124 {offsets = [0, 0, 0], sizes = [1, 8, 64], strides = [1, 1, 1]} : vector<1x8x128xbf16> to vector<1x8x64xbf16>
    %128 = vector.extract_strided_slice %125 {offsets = [0, 0, 0], sizes = [1, 8, 64], strides = [1, 1, 1]} : vector<1x8x128xbf16> to vector<1x8x64xbf16>
    "tpu.trace_start"() <{level = 10 : i32, message = "bqd,bkd->bqk"}> : () -> ()
    %cst_59 = arith.constant dense<0.000000e+00> : vector<1x8x8xf32>
    %129 = tpu.matmul %127, %128, %cst_59 {dimension_numbers = #tpu.dot_dimension_numbers<[2], [2], [1], [1], [0, 0, 0, 1, 1, 1], [0], [0]>} : vector<1x8x64xbf16>, vector<1x8x64xbf16>, vector<1x8x8xf32> -> vector<1x8x8xf32>
    "tpu.trace_stop"() : () -> ()
    %cst_60 = arith.constant 1.250000e-01 : f32
    %130 = vector.broadcast %cst_60 : f32 to vector<1x8x8xf32>
    %131 = arith.mulf %129, %130 : vector<1x8x8xf32>
    %132 = vector.broadcast %123 : vector<1x1x8xf32> to vector<1x8x8xf32>
    %133 = arith.addf %131, %132 : vector<1x8x8xf32>
    %cst_61 = arith.constant dense<0xFF800000> : vector<1x8xf32>
    %134 = vector.multi_reduction <maximumf>, %133, %cst_61 [2] : vector<1x8x8xf32> to vector<1x8xf32>
    %135 = vector.shape_cast %134 : vector<1x8xf32> to vector<1x8x1xf32>
    %136 = vector.broadcast %135 : vector<1x8x1xf32> to vector<1x8x8xf32>
    %137 = arith.subf %133, %136 : vector<1x8x8xf32>
    %138 = math.exp %137 : vector<1x8x8xf32>
    %cst_62 = arith.constant dense<0.000000e+00> : vector<1x8xf32>
    %139 = vector.multi_reduction <add>, %138, %cst_62 [2] : vector<1x8x8xf32> to vector<1x8xf32>
    %140 = vector.shape_cast %139 : vector<1x8xf32> to vector<1x8x1xf32>
    %141 = tpu.reciprocal %140 {approx = true} : vector<1x8x1xf32> -> vector<1x8x1xf32>
    %142 = vector.broadcast %141 : vector<1x8x1xf32> to vector<1x8x8xf32>
    %143 = arith.mulf %138, %142 : vector<1x8x8xf32>
    %144 = arith.truncf %143 : vector<1x8x8xf32> to vector<1x8x8xbf16>
    %145 = vector.extract_strided_slice %126 {offsets = [0, 0, 0], sizes = [1, 8, 64], strides = [1, 1, 1]} : vector<1x8x128xbf16> to vector<1x8x64xbf16>
    "tpu.trace_start"() <{level = 10 : i32, message = "bqk,bkd->bqd"}> : () -> ()
    %cst_63 = arith.constant dense<0.000000e+00> : vector<1x8x64xf32>
    %146 = tpu.matmul %144, %145, %cst_63 {dimension_numbers = #tpu.dot_dimension_numbers<[2], [1], [1], [2], [0, 0, 0, 1, 1, 2], [0], [0]>} : vector<1x8x8xbf16>, vector<1x8x64xbf16>, vector<1x8x64xf32> -> vector<1x8x64xf32>
    "tpu.trace_stop"() : () -> ()
    %147 = vector.extract_strided_slice %124 {offsets = [0, 0, 64], sizes = [1, 8, 64], strides = [1, 1, 1]} : vector<1x8x128xbf16> to vector<1x8x64xbf16>
    %148 = vector.extract_strided_slice %125 {offsets = [0, 0, 64], sizes = [1, 8, 64], strides = [1, 1, 1]} : vector<1x8x128xbf16> to vector<1x8x64xbf16>
    "tpu.trace_start"() <{level = 10 : i32, message = "bqd,bkd->bqk"}> : () -> ()
    %cst_64 = arith.constant dense<0.000000e+00> : vector<1x8x8xf32>
    %149 = tpu.matmul %147, %148, %cst_64 {dimension_numbers = #tpu.dot_dimension_numbers<[2], [2], [1], [1], [0, 0, 0, 1, 1, 1], [0], [0]>} : vector<1x8x64xbf16>, vector<1x8x64xbf16>, vector<1x8x8xf32> -> vector<1x8x8xf32>
    "tpu.trace_stop"() : () -> ()
    %cst_65 = arith.constant 1.250000e-01 : f32
    %150 = vector.broadcast %cst_65 : f32 to vector<1x8x8xf32>
    %151 = arith.mulf %149, %150 : vector<1x8x8xf32>
    %152 = vector.broadcast %123 : vector<1x1x8xf32> to vector<1x8x8xf32>
    %153 = arith.addf %151, %152 : vector<1x8x8xf32>
    %cst_66 = arith.constant dense<0xFF800000> : vector<1x8xf32>
    %154 = vector.multi_reduction <maximumf>, %153, %cst_66 [2] : vector<1x8x8xf32> to vector<1x8xf32>
    %155 = vector.shape_cast %154 : vector<1x8xf32> to vector<1x8x1xf32>
    %156 = vector.broadcast %155 : vector<1x8x1xf32> to vector<1x8x8xf32>
    %157 = arith.subf %153, %156 : vector<1x8x8xf32>
    %158 = math.exp %157 : vector<1x8x8xf32>
    %cst_67 = arith.constant dense<0.000000e+00> : vector<1x8xf32>
    %159 = vector.multi_reduction <add>, %158, %cst_67 [2] : vector<1x8x8xf32> to vector<1x8xf32>
    %160 = vector.shape_cast %159 : vector<1x8xf32> to vector<1x8x1xf32>
    %161 = tpu.reciprocal %160 {approx = true} : vector<1x8x1xf32> -> vector<1x8x1xf32>
    %162 = vector.broadcast %161 : vector<1x8x1xf32> to vector<1x8x8xf32>
    %163 = arith.mulf %158, %162 : vector<1x8x8xf32>
    %164 = arith.truncf %163 : vector<1x8x8xf32> to vector<1x8x8xbf16>
    %165 = vector.extract_strided_slice %126 {offsets = [0, 0, 64], sizes = [1, 8, 64], strides = [1, 1, 1]} : vector<1x8x128xbf16> to vector<1x8x64xbf16>
    "tpu.trace_start"() <{level = 10 : i32, message = "bqk,bkd->bqd"}> : () -> ()
    %cst_68 = arith.constant dense<0.000000e+00> : vector<1x8x64xf32>
    %166 = tpu.matmul %164, %165, %cst_68 {dimension_numbers = #tpu.dot_dimension_numbers<[2], [1], [1], [2], [0, 0, 0, 1, 1, 2], [0], [0]>} : vector<1x8x8xbf16>, vector<1x8x64xbf16>, vector<1x8x64xf32> -> vector<1x8x64xf32>
    "tpu.trace_stop"() : () -> ()
    %167 = tpu.concatenate %146, %166 in 2 : vector<1x8x64xf32>, vector<1x8x64xf32> -> vector<1x8x128xf32>
    %168 = vector.shape_cast %167 : vector<1x8x128xf32> to vector<8x128xf32>
    %169 = arith.truncf %168 : vector<8x128xf32> to vector<8x128xbf16>
    %c0_69 = arith.constant 0 : index
    %c0_70 = arith.constant 0 : index
    %170 = vector.load %arg22[%c0_69, %c0_70] : memref<128x128xbf16, #tpu.memory_space<vmem>>, vector<128x128xbf16>
    %cst_71 = arith.constant dense<0.000000e+00> : vector<8x128xf32>
    %171 = tpu.matmul %169, %170, %cst_71 {dimension_numbers = #tpu.dot_dimension_numbers<[1], [0], [0], [1], [0, 0, 1, 1], [], []>} : vector<8x128xbf16>, vector<128x128xbf16>, vector<8x128xf32> -> vector<8x128xf32>
    %c0_72 = arith.constant 0 : index
    %c0_73 = arith.constant 0 : index
    %172 = vector.load %arg23[%c0_72, %c0_73] : memref<1x128xf32, #tpu.memory_space<vmem>>, vector<1x128xf32>
    %173 = vector.broadcast %172 : vector<1x128xf32> to vector<8x128xf32>
    %174 = arith.addf %171, %173 : vector<8x128xf32>
    %175 = arith.addf %174, %23 : vector<8x128xf32>
    %176 = vector.shape_cast %175 : vector<8x128xf32> to vector<1x8x128xf32>
    %c0_74 = arith.constant 0 : index
    %c0_75 = arith.constant 0 : index
    %c0_76 = arith.constant 0 : index
    %177 = vector.load %arg4[%c0_74, %c0_75, %c0_76] : memref<1x1x8xf32, #tpu.memory_space<vmem>>, vector<1x1x8xf32>
    "tpu.trace_start"() <{level = 10 : i32, message = "bql,bld->bqd"}> : () -> ()
    %cst_77 = arith.constant dense<0.000000e+00> : vector<1x1x128xf32>
    %178 = tpu.matmul %177, %176, %cst_77 {dimension_numbers = #tpu.dot_dimension_numbers<[2], [1], [1], [2], [0, 0, 0, 1, 1, 2], [0], [0]>} : vector<1x1x8xf32>, vector<1x8x128xf32>, vector<1x1x128xf32> -> vector<1x1x128xf32>
    "tpu.trace_stop"() : () -> ()
    %179 = vector.shape_cast %178 : vector<1x1x128xf32> to vector<1x128xf32>
    %c0_78 = arith.constant 0 : index
    %c0_79 = arith.constant 0 : index
    %c0_80 = arith.constant 0 : index
    %180 = vector.load %arg5[%c0_78, %c0_79, %c0_80] : memref<1x8x128xf32, #tpu.memory_space<vmem>>, vector<1x8x128xf32>
    %181 = vector.shape_cast %180 : vector<1x8x128xf32> to vector<8x128xf32>
    %c0_81 = arith.constant 0 : index
    %c0_82 = arith.constant 0 : index
    %182 = vector.load %arg24[%c0_81, %c0_82] : memref<1x128xf32, #tpu.memory_space<vmem>>, vector<1x128xf32>
    %c0_83 = arith.constant 0 : index
    %c0_84 = arith.constant 0 : index
    %183 = vector.load %arg25[%c0_83, %c0_84] : memref<1x128xf32, #tpu.memory_space<vmem>>, vector<1x128xf32>
    %cst_85 = arith.constant dense<0.000000e+00> : vector<1xf32>
    %184 = vector.multi_reduction <add>, %179, %cst_85 [1] : vector<1x128xf32> to vector<1xf32>
    %185 = vector.shape_cast %184 : vector<1xf32> to vector<1x1xf32>
    %cst_86 = arith.constant 1.280000e+02 : f32
    %186 = vector.broadcast %cst_86 : f32 to vector<1x1xf32>
    %187 = arith.divf %185, %186 : vector<1x1xf32>
    %188 = vector.broadcast %187 : vector<1x1xf32> to vector<1x128xf32>
    %189 = arith.subf %179, %188 : vector<1x128xf32>
    %190 = arith.mulf %189, %189 : vector<1x128xf32>
    %cst_87 = arith.constant dense<0.000000e+00> : vector<1xf32>
    %191 = vector.multi_reduction <add>, %190, %cst_87 [1] : vector<1x128xf32> to vector<1xf32>
    %192 = vector.shape_cast %191 : vector<1xf32> to vector<1x1xf32>
    %cst_88 = arith.constant 1.280000e+02 : f32
    %193 = vector.broadcast %cst_88 : f32 to vector<1x1xf32>
    %194 = arith.divf %192, %193 : vector<1x1xf32>
    %cst_89 = arith.constant 9.99999993E-9 : f32
    %195 = vector.broadcast %cst_89 : f32 to vector<1x1xf32>
    %196 = arith.addf %194, %195 : vector<1x1xf32>
    %197 = math.rsqrt %196 : vector<1x1xf32>
    %198 = vector.broadcast %197 : vector<1x1xf32> to vector<1x128xf32>
    %199 = arith.mulf %189, %198 : vector<1x128xf32>
    %200 = arith.mulf %199, %182 : vector<1x128xf32>
    %201 = arith.addf %200, %183 : vector<1x128xf32>
    %202 = arith.truncf %201 : vector<1x128xf32> to vector<1x128xbf16>
    %c0_90 = arith.constant 0 : index
    %c0_91 = arith.constant 0 : index
    %203 = vector.load %arg14[%c0_90, %c0_91] : memref<128x256xbf16, #tpu.memory_space<vmem>>, vector<128x256xbf16>
    %cst_92 = arith.constant dense<0.000000e+00> : vector<1x256xf32>
    %204 = tpu.matmul %202, %203, %cst_92 {dimension_numbers = #tpu.dot_dimension_numbers<[1], [0], [0], [1], [0, 0, 1, 1], [], []>} : vector<1x128xbf16>, vector<128x256xbf16>, vector<1x256xf32> -> vector<1x256xf32>
    %c0_93 = arith.constant 0 : index
    %c0_94 = arith.constant 0 : index
    %205 = vector.load %arg15[%c0_93, %c0_94] : memref<1x256xf32, #tpu.memory_space<vmem>>, vector<1x256xf32>
    %206 = arith.addf %204, %205 : vector<1x256xf32>
    %207 = vector.extract_strided_slice %206 {offsets = [0, 0], sizes = [1, 128], strides = [1, 1]} : vector<1x256xf32> to vector<1x128xf32>
    %208 = arith.truncf %181 : vector<8x128xf32> to vector<8x128xbf16>
    %c0_95 = arith.constant 0 : index
    %c0_96 = arith.constant 0 : index
    %209 = vector.load %arg16[%c0_95, %c0_96] : memref<128x256xbf16, #tpu.memory_space<vmem>>, vector<128x256xbf16>
    %cst_97 = arith.constant dense<0.000000e+00> : vector<8x256xf32>
    %210 = tpu.matmul %208, %209, %cst_97 {dimension_numbers = #tpu.dot_dimension_numbers<[1], [0], [0], [1], [0, 0, 1, 1], [], []>} : vector<8x128xbf16>, vector<128x256xbf16>, vector<8x256xf32> -> vector<8x256xf32>
    %c0_98 = arith.constant 0 : index
    %c0_99 = arith.constant 0 : index
    %211 = vector.load %arg17[%c0_98, %c0_99] : memref<1x256xf32, #tpu.memory_space<vmem>>, vector<1x256xf32>
    %212 = vector.broadcast %211 : vector<1x256xf32> to vector<8x256xf32>
    %213 = arith.addf %210, %212 : vector<8x256xf32>
    %214 = vector.extract_strided_slice %213 {offsets = [0, 0], sizes = [8, 128], strides = [1, 1]} : vector<8x256xf32> to vector<8x128xf32>
    %215 = vector.extract_strided_slice %213 {offsets = [0, 128], sizes = [8, 128], strides = [1, 1]} : vector<8x256xf32> to vector<8x128xf32>
    %216 = vector.shape_cast %207 : vector<1x128xf32> to vector<1x1x128xf32>
    %217 = vector.shape_cast %214 : vector<8x128xf32> to vector<1x8x128xf32>
    %218 = vector.shape_cast %215 : vector<8x128xf32> to vector<1x8x128xf32>
    %c0_100 = arith.constant 0 : index
    %c0_101 = arith.constant 0 : index
    %c0_102 = arith.constant 0 : index
    %219 = vector.load %arg6[%c0_100, %c0_101, %c0_102] : memref<1x1x8xf32, #tpu.memory_space<vmem>>, vector<1x1x8xf32>
    %220 = arith.truncf %216 : vector<1x1x128xf32> to vector<1x1x128xbf16>
    %221 = arith.truncf %217 : vector<1x8x128xf32> to vector<1x8x128xbf16>
    %222 = arith.truncf %218 : vector<1x8x128xf32> to vector<1x8x128xbf16>
    %223 = vector.extract_strided_slice %220 {offsets = [0, 0, 0], sizes = [1, 1, 64], strides = [1, 1, 1]} : vector<1x1x128xbf16> to vector<1x1x64xbf16>
    %224 = vector.extract_strided_slice %221 {offsets = [0, 0, 0], sizes = [1, 8, 64], strides = [1, 1, 1]} : vector<1x8x128xbf16> to vector<1x8x64xbf16>
    "tpu.trace_start"() <{level = 10 : i32, message = "bqd,bkd->bqk"}> : () -> ()
    %cst_103 = arith.constant dense<0.000000e+00> : vector<1x1x8xf32>
    %225 = tpu.matmul %223, %224, %cst_103 {dimension_numbers = #tpu.dot_dimension_numbers<[2], [2], [1], [1], [0, 0, 0, 1, 1, 1], [0], [0]>} : vector<1x1x64xbf16>, vector<1x8x64xbf16>, vector<1x1x8xf32> -> vector<1x1x8xf32>
    "tpu.trace_stop"() : () -> ()
    %cst_104 = arith.constant 1.250000e-01 : f32
    %226 = vector.broadcast %cst_104 : f32 to vector<1x1x8xf32>
    %227 = arith.mulf %225, %226 : vector<1x1x8xf32>
    %228 = arith.addf %227, %219 : vector<1x1x8xf32>
    %cst_105 = arith.constant dense<0xFF800000> : vector<1x1xf32>
    %229 = vector.multi_reduction <maximumf>, %228, %cst_105 [2] : vector<1x1x8xf32> to vector<1x1xf32>
    %230 = vector.shape_cast %229 : vector<1x1xf32> to vector<1x1x1xf32>
    %231 = vector.broadcast %230 : vector<1x1x1xf32> to vector<1x1x8xf32>
    %232 = arith.subf %228, %231 : vector<1x1x8xf32>
    %233 = math.exp %232 : vector<1x1x8xf32>
    %cst_106 = arith.constant dense<0.000000e+00> : vector<1x1xf32>
    %234 = vector.multi_reduction <add>, %233, %cst_106 [2] : vector<1x1x8xf32> to vector<1x1xf32>
    %235 = vector.shape_cast %234 : vector<1x1xf32> to vector<1x1x1xf32>
    %236 = tpu.reciprocal %235 {approx = true} : vector<1x1x1xf32> -> vector<1x1x1xf32>
    %237 = vector.broadcast %236 : vector<1x1x1xf32> to vector<1x1x8xf32>
    %238 = arith.mulf %233, %237 : vector<1x1x8xf32>
    %239 = arith.truncf %238 : vector<1x1x8xf32> to vector<1x1x8xbf16>
    %240 = vector.extract_strided_slice %222 {offsets = [0, 0, 0], sizes = [1, 8, 64], strides = [1, 1, 1]} : vector<1x8x128xbf16> to vector<1x8x64xbf16>
    "tpu.trace_start"() <{level = 10 : i32, message = "bqk,bkd->bqd"}> : () -> ()
    %cst_107 = arith.constant dense<0.000000e+00> : vector<1x1x64xf32>
    %241 = tpu.matmul %239, %240, %cst_107 {dimension_numbers = #tpu.dot_dimension_numbers<[2], [1], [1], [2], [0, 0, 0, 1, 1, 2], [0], [0]>} : vector<1x1x8xbf16>, vector<1x8x64xbf16>, vector<1x1x64xf32> -> vector<1x1x64xf32>
    "tpu.trace_stop"() : () -> ()
    %242 = vector.extract_strided_slice %220 {offsets = [0, 0, 64], sizes = [1, 1, 64], strides = [1, 1, 1]} : vector<1x1x128xbf16> to vector<1x1x64xbf16>
    %243 = vector.extract_strided_slice %221 {offsets = [0, 0, 64], sizes = [1, 8, 64], strides = [1, 1, 1]} : vector<1x8x128xbf16> to vector<1x8x64xbf16>
    "tpu.trace_start"() <{level = 10 : i32, message = "bqd,bkd->bqk"}> : () -> ()
    %cst_108 = arith.constant dense<0.000000e+00> : vector<1x1x8xf32>
    %244 = tpu.matmul %242, %243, %cst_108 {dimension_numbers = #tpu.dot_dimension_numbers<[2], [2], [1], [1], [0, 0, 0, 1, 1, 1], [0], [0]>} : vector<1x1x64xbf16>, vector<1x8x64xbf16>, vector<1x1x8xf32> -> vector<1x1x8xf32>
    "tpu.trace_stop"() : () -> ()
    %cst_109 = arith.constant 1.250000e-01 : f32
    %245 = vector.broadcast %cst_109 : f32 to vector<1x1x8xf32>
    %246 = arith.mulf %244, %245 : vector<1x1x8xf32>
    %247 = arith.addf %246, %219 : vector<1x1x8xf32>
    %cst_110 = arith.constant dense<0xFF800000> : vector<1x1xf32>
    %248 = vector.multi_reduction <maximumf>, %247, %cst_110 [2] : vector<1x1x8xf32> to vector<1x1xf32>
    %249 = vector.shape_cast %248 : vector<1x1xf32> to vector<1x1x1xf32>
    %250 = vector.broadcast %249 : vector<1x1x1xf32> to vector<1x1x8xf32>
    %251 = arith.subf %247, %250 : vector<1x1x8xf32>
    %252 = math.exp %251 : vector<1x1x8xf32>
    %cst_111 = arith.constant dense<0.000000e+00> : vector<1x1xf32>
    %253 = vector.multi_reduction <add>, %252, %cst_111 [2] : vector<1x1x8xf32> to vector<1x1xf32>
    %254 = vector.shape_cast %253 : vector<1x1xf32> to vector<1x1x1xf32>
    %255 = tpu.reciprocal %254 {approx = true} : vector<1x1x1xf32> -> vector<1x1x1xf32>
    %256 = vector.broadcast %255 : vector<1x1x1xf32> to vector<1x1x8xf32>
    %257 = arith.mulf %252, %256 : vector<1x1x8xf32>
    %258 = arith.truncf %257 : vector<1x1x8xf32> to vector<1x1x8xbf16>
    %259 = vector.extract_strided_slice %222 {offsets = [0, 0, 64], sizes = [1, 8, 64], strides = [1, 1, 1]} : vector<1x8x128xbf16> to vector<1x8x64xbf16>
    "tpu.trace_start"() <{level = 10 : i32, message = "bqk,bkd->bqd"}> : () -> ()
    %cst_112 = arith.constant dense<0.000000e+00> : vector<1x1x64xf32>
    %260 = tpu.matmul %258, %259, %cst_112 {dimension_numbers = #tpu.dot_dimension_numbers<[2], [1], [1], [2], [0, 0, 0, 1, 1, 2], [0], [0]>} : vector<1x1x8xbf16>, vector<1x8x64xbf16>, vector<1x1x64xf32> -> vector<1x1x64xf32>
    "tpu.trace_stop"() : () -> ()
    %261 = tpu.concatenate %241, %260 in 2 : vector<1x1x64xf32>, vector<1x1x64xf32> -> vector<1x1x128xf32>
    %262 = vector.shape_cast %261 : vector<1x1x128xf32> to vector<1x128xf32>
    %263 = arith.truncf %262 : vector<1x128xf32> to vector<1x128xbf16>
    %c0_113 = arith.constant 0 : index
    %c0_114 = arith.constant 0 : index
    %264 = vector.load %arg18[%c0_113, %c0_114] : memref<128x128xbf16, #tpu.memory_space<vmem>>, vector<128x128xbf16>
    %cst_115 = arith.constant dense<0.000000e+00> : vector<1x128xf32>
    %265 = tpu.matmul %263, %264, %cst_115 {dimension_numbers = #tpu.dot_dimension_numbers<[1], [0], [0], [1], [0, 0, 1, 1], [], []>} : vector<1x128xbf16>, vector<128x128xbf16>, vector<1x128xf32> -> vector<1x128xf32>
    %c0_116 = arith.constant 0 : index
    %c0_117 = arith.constant 0 : index
    %266 = vector.load %arg19[%c0_116, %c0_117] : memref<1x128xf32, #tpu.memory_space<vmem>>, vector<1x128xf32>
    %267 = arith.addf %265, %266 : vector<1x128xf32>
    %c0_118 = arith.constant 0 : index
    %c0_119 = arith.constant 0 : index
    %268 = vector.load %arg26[%c0_118, %c0_119] : memref<1x128xf32, #tpu.memory_space<vmem>>, vector<1x128xf32>
    %c0_120 = arith.constant 0 : index
    %c0_121 = arith.constant 0 : index
    %269 = vector.load %arg27[%c0_120, %c0_121] : memref<1x128xf32, #tpu.memory_space<vmem>>, vector<1x128xf32>
    %cst_122 = arith.constant dense<0.000000e+00> : vector<1xf32>
    %270 = vector.multi_reduction <add>, %267, %cst_122 [1] : vector<1x128xf32> to vector<1xf32>
    %271 = vector.shape_cast %270 : vector<1xf32> to vector<1x1xf32>
    %cst_123 = arith.constant 1.280000e+02 : f32
    %272 = vector.broadcast %cst_123 : f32 to vector<1x1xf32>
    %273 = arith.divf %271, %272 : vector<1x1xf32>
    %274 = vector.broadcast %273 : vector<1x1xf32> to vector<1x128xf32>
    %275 = arith.subf %267, %274 : vector<1x128xf32>
    %276 = arith.mulf %275, %275 : vector<1x128xf32>
    %cst_124 = arith.constant dense<0.000000e+00> : vector<1xf32>
    %277 = vector.multi_reduction <add>, %276, %cst_124 [1] : vector<1x128xf32> to vector<1xf32>
    %278 = vector.shape_cast %277 : vector<1xf32> to vector<1x1xf32>
    %cst_125 = arith.constant 1.280000e+02 : f32
    %279 = vector.broadcast %cst_125 : f32 to vector<1x1xf32>
    %280 = arith.divf %278, %279 : vector<1x1xf32>
    %cst_126 = arith.constant 9.99999993E-9 : f32
    %281 = vector.broadcast %cst_126 : f32 to vector<1x1xf32>
    %282 = arith.addf %280, %281 : vector<1x1xf32>
    %283 = math.rsqrt %282 : vector<1x1xf32>
    %284 = vector.broadcast %283 : vector<1x1xf32> to vector<1x128xf32>
    %285 = arith.mulf %275, %284 : vector<1x128xf32>
    %286 = arith.mulf %285, %268 : vector<1x128xf32>
    %287 = arith.addf %286, %269 : vector<1x128xf32>
    %288 = arith.addf %179, %287 : vector<1x128xf32>
    %289 = vector.shape_cast %288 : vector<1x128xf32> to vector<1x1x128xf32>
    %c0_127 = arith.constant 0 : index
    %c0_128 = arith.constant 0 : index
    %c0_129 = arith.constant 0 : index
    %290 = vector.load %arg28[%c0_127, %c0_128, %c0_129] : memref<1x1x128xf32, #tpu.memory_space<vmem>>, vector<1x1x128xf32>
    tpu.vector_store %arg28[%c0_127, %c0_128, %c0_129], %289 {strides = array<i32>} : memref<1x1x128xf32, #tpu.memory_space<vmem>>, vector<1x1x128xf32>,
    return
  }
  func.func @transform_0(%arg0: i32) -> (i32, i32, i32) {
    %c0_i32 = arith.constant 0 : i32
    %c0_i32_0 = arith.constant 0 : i32
    %c0_i32_1 = arith.constant 0 : i32
    return %arg0, %c0_i32, %c0_i32_0 : i32, i32, i32
  }
  func.func @transform_1(%arg0: i32) -> (i32, i32, i32) {
    %c0_i32 = arith.constant 0 : i32
    %c0_i32_0 = arith.constant 0 : i32
    %c0_i32_1 = arith.constant 0 : i32
    return %arg0, %c0_i32, %c0_i32_0 : i32, i32, i32
  }
  func.func @transform_2(%arg0: i32) -> (i32, i32, i32) {
    %c0_i32 = arith.constant 0 : i32
    %c0_i32_0 = arith.constant 0 : i32
    %c0_i32_1 = arith.constant 0 : i32
    %c0_i32_2 = arith.constant 0 : i32
    return %c0_i32, %c0_i32_0, %c0_i32_1 : i32, i32, i32
  }
  func.func @transform_3(%arg0: i32) -> (i32, i32, i32) {
    %c0_i32 = arith.constant 0 : i32
    %c0_i32_0 = arith.constant 0 : i32
    %c0_i32_1 = arith.constant 0 : i32
    return %arg0, %c0_i32, %c0_i32_0 : i32, i32, i32
  }
  func.func @transform_4(%arg0: i32) -> (i32, i32, i32) {
    %c0_i32 = arith.constant 0 : i32
    %c0_i32_0 = arith.constant 0 : i32
    %c0_i32_1 = arith.constant 0 : i32
    return %arg0, %c0_i32, %c0_i32_0 : i32, i32, i32
  }
  func.func @transform_5(%arg0: i32) -> (i32, i32, i32) {
    %c0_i32 = arith.constant 0 : i32
    %c0_i32_0 = arith.constant 0 : i32
    %c0_i32_1 = arith.constant 0 : i32
    return %arg0, %c0_i32, %c0_i32_0 : i32, i32, i32
  }
  func.func @transform_6(%arg0: i32) -> (i32, i32) {
    %c0_i32 = arith.constant 0 : i32
    %c0_i32_0 = arith.constant 0 : i32
    %c0_i32_1 = arith.constant 0 : i32
    return %c0_i32, %c0_i32_0 : i32, i32
  }
  func.func @transform_7(%arg0: i32) -> (i32, i32) {
    %c0_i32 = arith.constant 0 : i32
    %c0_i32_0 = arith.constant 0 : i32
    %c0_i32_1 = arith.constant 0 : i32
    return %c0_i32, %c0_i32_0 : i32, i32
  }
  func.func @transform_8(%arg0: i32) -> (i32, i32) {
    %c0_i32 = arith.constant 0 : i32
    %c0_i32_0 = arith.constant 0 : i32
    %c0_i32_1 = arith.constant 0 : i32
    return %c0_i32, %c0_i32_0 : i32, i32
  }
  func.func @transform_9(%arg0: i32) -> (i32, i32) {
    %c0_i32 = arith.constant 0 : i32
    %c0_i32_0 = arith.constant 0 : i32
    %c0_i32_1 = arith.constant 0 : i32
    return %c0_i32, %c0_i32_0 : i32, i32
  }
  func.func @transform_10(%arg0: i32) -> (i32, i32) {
    %c0_i32 = arith.constant 0 : i32
    %c0_i32_0 = arith.constant 0 : i32
    %c0_i32_1 = arith.constant 0 : i32
    return %c0_i32, %c0_i32_0 : i32, i32
  }
  func.func @transform_11(%arg0: i32) -> (i32, i32) {
    %c0_i32 = arith.constant 0 : i32
    %c0_i32_0 = arith.constant 0 : i32
    %c0_i32_1 = arith.constant 0 : i32
    return %c0_i32, %c0_i32_0 : i32, i32
  }
  func.func @transform_12(%arg0: i32) -> (i32, i32) {
    %c0_i32 = arith.constant 0 : i32
    %c0_i32_0 = arith.constant 0 : i32
    %c0_i32_1 = arith.constant 0 : i32
    return %c0_i32, %c0_i32_0 : i32, i32
  }
  func.func @transform_13(%arg0: i32) -> (i32, i32) {
    %c0_i32 = arith.constant 0 : i32
    %c0_i32_0 = arith.constant 0 : i32
    %c0_i32_1 = arith.constant 0 : i32
    return %c0_i32, %c0_i32_0 : i32, i32
  }
  func.func @transform_14(%arg0: i32) -> (i32, i32) {
    %c0_i32 = arith.constant 0 : i32
    %c0_i32_0 = arith.constant 0 : i32
    %c0_i32_1 = arith.constant 0 : i32
    return %c0_i32, %c0_i32_0 : i32, i32
  }
  func.func @transform_15(%arg0: i32) -> (i32, i32) {
    %c0_i32 = arith.constant 0 : i32
    %c0_i32_0 = arith.constant 0 : i32
    %c0_i32_1 = arith.constant 0 : i32
    return %c0_i32, %c0_i32_0 : i32, i32
  }
  func.func @transform_16(%arg0: i32) -> (i32, i32) {
    %c0_i32 = arith.constant 0 : i32
    %c0_i32_0 = arith.constant 0 : i32
    %c0_i32_1 = arith.constant 0 : i32
    return %c0_i32, %c0_i32_0 : i32, i32
  }
  func.func @transform_17(%arg0: i32) -> (i32, i32) {
    %c0_i32 = arith.constant 0 : i32
    %c0_i32_0 = arith.constant 0 : i32
    %c0_i32_1 = arith.constant 0 : i32
    return %c0_i32, %c0_i32_0 : i32, i32
  }
  func.func @transform_18(%arg0: i32) -> (i32, i32) {
    %c0_i32 = arith.constant 0 : i32
    %c0_i32_0 = arith.constant 0 : i32
    %c0_i32_1 = arith.constant 0 : i32
    return %c0_i32, %c0_i32_0 : i32, i32
  }
  func.func @transform_19(%arg0: i32) -> (i32, i32) {
    %c0_i32 = arith.constant 0 : i32
    %c0_i32_0 = arith.constant 0 : i32
    %c0_i32_1 = arith.constant 0 : i32
    return %c0_i32, %c0_i32_0 : i32, i32
  }
  func.func @transform_20(%arg0: i32) -> (i32, i32) {
    %c0_i32 = arith.constant 0 : i32
    %c0_i32_0 = arith.constant 0 : i32
    %c0_i32_1 = arith.constant 0 : i32
    return %c0_i32, %c0_i32_0 : i32, i32
  }
  func.func @transform_21(%arg0: i32) -> (i32, i32) {
    %c0_i32 = arith.constant 0 : i32
    %c0_i32_0 = arith.constant 0 : i32
    %c0_i32_1 = arith.constant 0 : i32
    return %c0_i32, %c0_i32_0 : i32, i32
  }
  func.func @transform_22(%arg0: i32) -> (i32, i32) {
    %c0_i32 = arith.constant 0 : i32
    %c0_i32_0 = arith.constant 0 : i32
    %c0_i32_1 = arith.constant 0 : i32
    return %c0_i32, %c0_i32_0 : i32, i32
  }
  func.func @transform_23(%arg0: i32) -> (i32, i32) {
    %c0_i32 = arith.constant 0 : i32
    %c0_i32_0 = arith.constant 0 : i32
    %c0_i32_1 = arith.constant 0 : i32
    return %c0_i32, %c0_i32_0 : i32, i32
  }
  func.func @transform_24(%arg0: i32) -> (i32, i32) {
    %c0_i32 = arith.constant 0 : i32
    %c0_i32_0 = arith.constant 0 : i32
    %c0_i32_1 = arith.constant 0 : i32
    return %c0_i32, %c0_i32_0 : i32, i32
  }
  func.func @transform_25(%arg0: i32) -> (i32, i32) {
    %c0_i32 = arith.constant 0 : i32
    %c0_i32_0 = arith.constant 0 : i32
    %c0_i32_1 = arith.constant 0 : i32
    return %c0_i32, %c0_i32_0 : i32, i32
  }
  func.func @transform_26(%arg0: i32) -> (i32, i32) {
    %c0_i32 = arith.constant 0 : i32
    %c0_i32_0 = arith.constant 0 : i32
    %c0_i32_1 = arith.constant 0 : i32
    return %c0_i32, %c0_i32_0 : i32, i32
  }
  func.func @transform_27(%arg0: i32) -> (i32, i32, i32) {
    %c0_i32 = arith.constant 0 : i32
    %c0_i32_0 = arith.constant 0 : i32
    %c0_i32_1 = arith.constant 0 : i32
    return %arg0, %c0_i32, %c0_i32_0 : i32, i32, i32
  }
}

</mosaic_0001>

<bundles_post_ra>
// kernel: tpu_custom_call.1
= control target key start
LH: loop header
LB: loop body
LE: loop exit
PB: predicated region body
PF: predicated region fallthrough
CT: control target
= control target key end

     0   :  { %s5613_s0 = inlined_call_operand.hbm [shape: f32[2,8,128], index: 0, kind: input, shape index: {}]   ;;  %s5614_s1 = inlined_call_operand.hbm [shape: f32[2,1,8], index: 1, kind: input, shape index: {}]   ;;  %s5615_s2 = inlined_call_operand.hbm [shape: f32[1,1,8], index: 2, kind: input, shape index: {}]   ;;  %s5616_s3 = inlined_call_operand.vmem [shape: f32[2,1,8], index: 3, kind: input, shape index: {}]   ;;  %s5617_s4 = inlined_call_operand.hbm [shape: f32[2,8,128], index: 4, kind: input, shape index: {}]   ;;  %s5618_s5 = inlined_call_operand.vmem [shape: f32[2,1,8], index: 5, kind: input, shape index: {}]   ;;  %s5619_s6 = inlined_call_operand.hbm [shape: f32[1,128], index: 6, kind: input, shape index: {}]   ;;  %s5620_s7 = inlined_call_operand.hbm [shape: f32[1,128], index: 7, kind: input, shape index: {}]   ;;  %s5621_s8 = inlined_call_operand.hbm [shape: bf16[128,256], index: 8, kind: input, shape index: {}]   ;;  %s5622_s9 = inlined_call_operand.vmem [shape: f32[1,256], index: 9, kind: input, shape index: {}]   ;;  %s5623_s10 = inlined_call_operand.hbm [shape: bf16[256,128], index: 10, kind: input, shape index: {}]   ;;  %s5624_s11 = inlined_call_operand.vmem [shape: f32[1,128], index: 11, kind: input, shape index: {}]   ;;  %s5625_s12 = inlined_call_operand.vmem [shape: f32[1,128], index: 12, kind: input, shape index: {}]   ;;  %s5626_s13 = inlined_call_operand.hbm [shape: bf16[128,256], index: 13, kind: input, shape index: {}]   ;;  %s5627_s14 = inlined_call_operand.vmem [shape: f32[1,256], index: 14, kind: input, shape index: {}]   ;;  %s5628_s15 = inlined_call_operand.hbm [shape: bf16[128,256], index: 15, kind: input, shape index: {}]   ;;  %s5629_s16 = inlined_call_operand.vmem [shape: f32[1,256], index: 16, kind: input, shape index: {}]   ;;  %s5630_s17 = inlined_call_operand.hbm [shape: bf16[128,128], index: 17, kind: input, shape index: {}]   ;;  %s5631_s18 = inlined_call_operand.vmem [shape: f32[1,128], index: 18, kind: input, shape index: {}]   ;;  %s5632_s19 = inlined_call_operand.hbm [shape: bf16[128,256], index: 19, kind: input, shape index: {}]   ;;  %s5633_s20 = inlined_call_operand.vmem [shape: f32[1,256], index: 20, kind: input, shape index: {}]   ;;  %s5634_s21 = inlined_call_operand.hbm [shape: bf16[128,128], index: 21, kind: input, shape index: {}]   ;;  %s5635_s22 = inlined_call_operand.vmem [shape: f32[1,128], index: 22, kind: input, shape index: {}]   ;;  %s5636_s23 = inlined_call_operand.vmem [shape: f32[1,128], index: 23, kind: input, shape index: {}]   ;;  %s5637_s24 = inlined_call_operand.vmem [shape: f32[1,128], index: 24, kind: input, shape index: {}]   ;;  %s5638_s25 = inlined_call_operand.vmem [shape: f32[1,128], index: 25, kind: input, shape index: {}]   ;;  %s5639_s26 = inlined_call_operand.vmem [shape: f32[1,128], index: 26, kind: input, shape index: {}]   ;;  %s5640_s27 = inlined_call_operand.hbm [shape: f32[2,1,128], index: 27, kind: output, shape index: {}]  }
   0x1   :  { %5658 = sst [smem:[#allocation40_spill]] %s5613_s0 }
   0x2   :  { %5659 = sst [smem:[#allocation41_spill]] %s5614_s1 }
   0x3   :  { %5660 = sst [smem:[#allocation42_spill]] %s5615_s2 }
   0x4   :  { %5661 = sst [smem:[#allocation43_spill]] %s5616_s3 }
   0x5   :  { %5662 = sst [smem:[#allocation44_spill]] %s5617_s4 }
   0x6   :  { %5663 = sst [smem:[#allocation45_spill]] %s5618_s5 }
   0x7   :  { %5664 = sst [smem:[#allocation46_spill]] %s5619_s6 }
   0x8   :  { %5665 = sst [smem:[#allocation47_spill]] %s5620_s7 }
   0x9   :  { %5666 = sst [smem:[#allocation48_spill]] %s5621_s8 }
   0xa   :  { %5667 = sst [smem:[#allocation49_spill]] %s5622_s9 }
   0xb   :  { %5668 = sst [smem:[#allocation50_spill]] %s5623_s10 }
   0xc   :  { %5669 = sst [smem:[#allocation51_spill]] %s5624_s11 }
   0xd   :  { %5670 = sst [smem:[#allocation52_spill]] %s5626_s13 }
   0xe   :  { %5671 = sst [smem:[#allocation53_spill]] %s5628_s15 }
   0xf   :  { %5672 = sst [smem:[#allocation54_spill]] %s5630_s17 }
  0x10   :  { %5673 = sst [smem:[#allocation55_spill]] %s5632_s19 }
  0x11   :  { %5674 = sst [smem:[#allocation56_spill]] %s5634_s21 }
  0x12   :  { %5675 = sst [smem:[#allocation57_spill]] %s5635_s22 }
  0x13   :  { %5676 = sst [smem:[#allocation58_spill]] %s5636_s23 }
  0x14   :  { %5677 = sst [smem:[#allocation59_spill]] %s5637_s24 }
  0x15   :  { %5678 = sst [smem:[#allocation60_spill]] %s5638_s25 }
  0x16   :  { %5679 = sst [smem:[#allocation61_spill]] %s5639_s26 }
  0x17   :  { %5680 = sst [smem:[#allocation62_spill]] %s5640_s27 }
  0x18   :  { %32 = vsyncpa [#allocation3], 0 }
  0x19   :  { %34 = vsyncpa [#allocation3 + $0x1], 0 }
  0x1a   :  { %35 = vsyncpa [#allocation6], 0 }
  0x1b   :  { %37 = vsyncpa [#allocation6 + $0x1], 0 }
  0x1c   :  { %38 = vsyncpa [#allocation9], 0 }
  0x1d   :  { %40 = vsyncpa [#allocation9 + $0x1], 0 }
  0x1e   :  { %41 = vsyncpa [#allocation12], 0 }
  0x1f   :  { %42 = vsyncpa [#allocation15], 0 }
  0x20   :  { %43 = vsyncpa [#allocation18], 0 }
  0x21   :  { %44 = vsyncpa [#allocation21], 0 }
  0x22   :  { %45 = vsyncpa [#allocation4], 0 }
  0x23   :  { %47 = vsyncpa [#allocation4 + $0x1], 0  ;;  %s4914_s7 = smov 0   ;;  %s4916_s4 = smov 0  }
  0x24   :  { %s4918_s8 = smov 0   ;;  %s4920_s30 = smov 0  }
  0x25 LB: > { %5681 = sst [smem:[#allocation34_spill]] %s4738_s7  ;;  %s4752_s9 = smov [#allocation7]   ;;  %s4750_s30 = sphi %s4920_s30, %s5743_s30   ;;  %s4746_s8 = sphi %s4918_s8, %s5745_s8   ;;  %s4742_s4 = sphi %s4916_s4, %s5747_s4   ;;  %s4738_s7 = sphi %s4914_s7, %s5746_s7  }
  0x26   : > { %5682 = sst [smem:[#allocation35_spill]] %s4746_s8  ;;  %s689_s5 = sshll.u32 %s4752_s9, 4  ;;  %s690_s5 = int_to_ptr.vmem [resolvable:$true] %s689_s5 }
  0x27   : > { %s4935_s28 = sadd.s32 4294967295, %s4750_s30   ;;  %p3565_p0 = scmp.ge.s32.totalorder %s4750_s30, 1 }
  0x28   : > { %p5647_p1 = scmp.eq.s32.totalorder %s4935_s28, 0  ;;  %p676_p2 = scmp.lt.s32.totalorder %s4750_s30, 3 }
  0x29   : > { %s4753_s10 = smov [#allocation10]   ;;  %s4754_s1 = smov [#allocation11]  }
  0x2a   : > { %p4940_p3 = pnand %p3565_p0, %p676_p2  ;;  %s700_s29 = sshll.u32 %s4753_s10, 4  ;;  %s4947_s29 = int_to_ptr.vmem [resolvable:$true] %s700_s29 }
  0x2b   : > { %s711_s6 = sshll.u32 %s4754_s1, 4  ;;  %s4755_s2 = smov [#allocation14]   ;;  %s4955_s6 = int_to_ptr.vmem [resolvable:$true] %s711_s6 }
  0x2c   : > { %s5683_s0 = scalar_select %p4940_p3, 1, 0 }
  0x2d   : > { %p4015_p5 = pneg %p4940_p3  ;;  %s4957_s3 = sshll.u32 %s4755_s2, 4  ;;  %s738_s3 = int_to_ptr.vmem [resolvable:$true] %s4957_s3 }
  0x2e   : > { %s4321_s10 = scalar_lea.vmem %s690_s5, 16  ;;  %s4328_s1 = scalar_lea.vmem %s690_s5, 32 }
  0x2f   : > { %p4951_p6 = pnand %p4015_p5, %p5647_p1  ;;  %p4322_p8 = scmp.ne.s32.totalorder %s690_s5, %s4321_s10 }
  0x30   : > { %p4329_p11 = scmp.lt.s32.totalorder %s690_s5, %s690_s5  ;;  %p4330_p12 = scmp.lt.s32.totalorder %s4328_s1, %s4321_s10 }
  0x31   : > { %p4961_p7 = pneg %p4951_p6 }
  0x32   : > { %p4331_p13 = por %p4330_p12, %p4329_p11 }
  0x33   : > { %p4324_p9 = pnand %p4322_p8, %p4961_p7 }
  0x35   : > { %p4325_p10 = pneg %p4324_p9 }
  0x37   : > { %p4332_p0 = pnand %p4331_p13, %p4325_p10 }
  0x39   : > { %4335 = shalt.err (!%p4332_p0)
}
  0x3a   : > { %s5686_s26 = sld [smem:[#allocation42_spill]]  ;;  %s4347_s25 = scalar_lea.vmem %s4947_s29, 16 }
  0x3b   : > { %p4348_p2 = scmp.ne.s32.totalorder %s4947_s29, %s4347_s25  ;;  %s4354_s10 = scalar_lea.vmem %s4947_s29, 32 }
  0x3c   : > { %p4355_p9 = scmp.lt.s32.totalorder %s4947_s29, %s4947_s29  ;;  %p4356_p10 = scmp.lt.s32.totalorder %s4354_s10, %s4347_s25 }
  0x3d   : > { %p4350_p5 = pnand %p4348_p2, %p4961_p7 }
  0x3e   : > { %p4357_p11 = por %p4356_p10, %p4355_p9 }
  0x3f   : > { %p4351_p8 = pneg %p4350_p5 }
  0x40   : > { %4018 = dma.hbm_to_vmem [thread:$0]  (!%p4951_p6), %s5686_s26, 16, %s690_s5, [#allocation6]  }
  0x41   : > { %p4358_p12 = pnand %p4357_p11, %p4351_p8 }
  0x43   : > { %4361 = shalt.err (!%p4358_p12)
}
  0x44   : > { %s5687_s2 = sld [smem:[#allocation46_spill]]  ;;  %s4373_s26 = scalar_lea.vmem %s4955_s6, 16 }
  0x45   : > { %p4374_p13 = scmp.ne.s32.totalorder %s4955_s6, %s4373_s26  ;;  %s4380_s25 = scalar_lea.vmem %s4955_s6, 32 }
  0x46   : > { %p4381_p5 = scmp.lt.s32.totalorder %s4955_s6, %s4955_s6  ;;  %p4382_p8 = scmp.lt.s32.totalorder %s4380_s25, %s4373_s26 }
  0x47   : > { %p4376_p0 = pnand %p4374_p13, %p4961_p7 }
  0x48   : > { %p4383_p9 = por %p4382_p8, %p4381_p5 }
  0x49   : > { %p4377_p2 = pneg %p4376_p0 }
  0x4a   : > { %4021 = dma.hbm_to_vmem [thread:$0]  (!%p4951_p6), %s5687_s2, 16, %s4947_s29, [#allocation9]  }
  0x4b   : > { %p4384_p10 = pnand %p4383_p9, %p4377_p2 }
  0x4d   : > { %4387 = shalt.err (!%p4384_p10)
}
  0x4e   : > { %s5688_s27 = sld [smem:[#allocation47_spill]]  ;;  %s4399_s29 = scalar_lea.vmem %s738_s3, 2048 }
  0x4f   : > { %p4400_p11 = scmp.ne.s32.totalorder %s738_s3, %s4399_s29  ;;  %p4407_p0 = scmp.lt.s32.totalorder %s738_s3, %s738_s3 }
  0x50   : > { %p4408_p4 = scmp.lt.s32.totalorder %s4399_s29, %s4399_s29 }
  0x51   : > { %p4402_p12 = pnand %p4400_p11, %p4961_p7 }
  0x52   : > { %p4409_p5 = por %p4408_p4, %p4407_p0 }
  0x53   : > { %p4403_p13 = pneg %p4402_p12 }
  0x54   : > { %4024 = dma.hbm_to_vmem [thread:$0]  (!%p4951_p6), %s5688_s27, 16, %s4955_s6, [#allocation12]  }
  0x55   : > { %p4410_p2 = pnand %p4409_p5, %p4403_p13 }
  0x57   : > { %4413 = shalt.err (!%p4410_p2)
}
  0x58   : > { %s4756_s1 = smov 64   ;;  %s4757_s2 = smov 4  }
  0x59   : > { %s5689_s25 = sld [smem:[#allocation50_spill]]  ;;  %s4758_s5 = smov [#allocation17]  }
  0x5a   : > { %s772_s10 = sshll.u32 %s4758_s5, 4  ;;  %s4759_s27 = smov [#allocation20]   ;;  %s773_s10 = int_to_ptr.vmem [resolvable:$true] %s772_s10 }
  0x5b   : > { %s804_s24 = sshll.u32 %s4759_s27, 4  ;;  %s4425_s29 = scalar_lea.vmem %s773_s10, 2048  ;;  %s805_s24 = int_to_ptr.vmem [resolvable:$true] %s804_s24 }
  0x5c   : > { %p4426_p4 = scmp.ne.s32.totalorder %s773_s10, %s4425_s29  ;;  %p4433_p10 = scmp.lt.s32.totalorder %s773_s10, %s773_s10 }
  0x5d   : > { %p4434_p11 = scmp.lt.s32.totalorder %s4425_s29, %s4425_s29 }
  0x5e   : > { %p4428_p8 = pnand %p4426_p4, %p4961_p7 }
  0x5f   : > { %4030 = dma.hbm_to_vmem [thread:$0]  (!%p4951_p6), %s5689_s25, 2048, %s738_s3, [#allocation15], %s4756_s1, %s4756_s1, %s4757_s2  }
  0x60   : > { %p4429_p9 = pneg %p4428_p8  ;;  %p4435_p12 = por %p4434_p11, %p4433_p10 }
  0x62   : > { %p4436_p13 = pnand %p4435_p12, %p4429_p9 }
  0x64   : > { %4439 = shalt.err (!%p4436_p13)
}
  0x65   : > { %s4760_s23 = smov 128   ;;  %s4761_s3 = smov 8  }
  0x66   : > { %s5690_s15 = sld [smem:[#allocation53_spill]]  ;;  %s4451_s25 = scalar_lea.vmem %s805_s24, 2048 }
  0x67   : > { %p4452_p0 = scmp.ne.s32.totalorder %s805_s24, %s4451_s25  ;;  %p4459_p4 = scmp.lt.s32.totalorder %s805_s24, %s805_s24 }
  0x68   : > { %p4460_p8 = scmp.lt.s32.totalorder %s4451_s25, %s4451_s25 }
  0x69   : > { %p4454_p5 = pnand %p4452_p0, %p4961_p7 }
  0x6a   : > { %p4461_p9 = por %p4460_p8, %p4459_p4 }
  0x6b   : > { %p4455_p2 = pneg %p4454_p5 }
  0x6c   : > { %4036 = dma.hbm_to_vmem [thread:$0]  (!%p4951_p6), %s5690_s15, 2048, %s773_s10, [#allocation18], %s4760_s23, %s4760_s23, %s4761_s3  }
  0x6d   : > { %p4462_p10 = pnand %p4461_p9, %p4455_p2 }
  0x6f   : > { %4465 = shalt.err (!%p4462_p10)
}
  0x70   : > { %s5691_s19 = sld [smem:[#allocation55_spill]]  ;;  %s4762_s10 = smov [#allocation13]  }
  0x71   : > { %s721_s29 = sshll.u32 %s4762_s10, 4  ;;  %s4763_s6 = smov [#allocation16]   ;;  %s722_s29 = int_to_ptr.vmem [resolvable:$true] %s721_s29 }
  0x72   : > { %s756_s26 = sshll.u32 %s4763_s6, 4  ;;  %s4477_s25 = scalar_lea.vmem %s722_s29, 2048  ;;  %s757_s26 = int_to_ptr.vmem [resolvable:$true] %s756_s26 }
  0x73   : > { %p4478_p11 = scmp.ne.s32.totalorder %s722_s29, %s4477_s25  ;;  %p4485_p0 = scmp.lt.s32.totalorder %s722_s29, %s722_s29 }
  0x74   : > { %p4486_p5 = scmp.lt.s32.totalorder %s4477_s25, %s4477_s25 }
  0x75   : > { %p4480_p12 = pnand %p4478_p11, %p4961_p7 }
  0x76   : > { %4042 = dma.hbm_to_vmem [thread:$0]  (!%p4951_p6), %s5691_s19, 2048, %s805_s24, [#allocation21], %s4760_s23, %s4760_s23, %s4761_s3  }
  0x77   : > { %p4481_p13 = pneg %p4480_p12  ;;  %p4487_p2 = por %p4486_p5, %p4485_p0 }
  0x79   : > { %p4488_p4 = pnand %p4487_p2, %p4481_p13 }
  0x7b   : > { %4491 = shalt.err (!%p4488_p4)
}
  0x7c   : > { %s5692_s27 = sld [smem:[#allocation48_spill]]  ;;  %s4503_s10 = scalar_lea.vmem %s757_s26, 2048 }
  0x7d   : > { %p4504_p8 = scmp.ne.s32.totalorder %s757_s26, %s4503_s10  ;;  %p4511_p11 = scmp.lt.s32.totalorder %s757_s26, %s757_s26 }
  0x7e   : > { %p4512_p12 = scmp.lt.s32.totalorder %s4503_s10, %s4503_s10 }
  0x7f   : > { %p4506_p9 = pnand %p4504_p8, %p4961_p7 }
  0x80   : > { %p4513_p0 = por %p4512_p12, %p4511_p11 }
  0x81   : > { %p4507_p10 = pneg %p4506_p9 }
  0x82   : > { %4027 = dma.hbm_to_vmem [thread:$0]  (!%p4951_p6), %s5692_s27, 2048, %s722_s29, [#allocation12], %s4760_s23, %s4760_s23, %s4761_s3  }
  0x83   : > { %p4514_p13 = pnand %p4513_p0, %p4507_p10 }
  0x85   : > { %4517 = shalt.err (!%p4514_p13)
}
  0x86   : > { %s5693_s13 = sld [smem:[#allocation52_spill]]  ;;  %s4764_s29 = smov [#allocation19]  }
  0x87   : > { %s788_s24 = sshll.u32 %s4764_s29, 4  ;;  %s4765_s5 = smov [#allocation22]   ;;  %s789_s24 = int_to_ptr.vmem [resolvable:$true] %s788_s24 }
  0x88   : > { %s820_s27 = sshll.u32 %s4765_s5, 4  ;;  %s4529_s10 = scalar_lea.vmem %s789_s24, 1024  ;;  %s821_s27 = int_to_ptr.vmem [resolvable:$true] %s820_s27 }
  0x89   : > { %p4530_p5 = scmp.ne.s32.totalorder %s789_s24, %s4529_s10  ;;  %p4537_p8 = scmp.lt.s32.totalorder %s789_s24, %s789_s24 }
  0x8a   : > { %p4538_p9 = scmp.lt.s32.totalorder %s4529_s10, %s4529_s10 }
  0x8b   : > { %p4532_p2 = pnand %p4530_p5, %p4961_p7 }
  0x8c   : > { %4033 = dma.hbm_to_vmem [thread:$0]  (!%p4951_p6), %s5693_s13, 2048, %s757_s26, [#allocation15], %s4760_s23, %s4760_s23, %s4761_s3  }
  0x8d   : > { %p4533_p4 = pneg %p4532_p2  ;;  %p4539_p10 = por %p4538_p9, %p4537_p8 }
  0x8f   : > { %p4540_p11 = pnand %p4539_p10, %p4533_p4 }
  0x91   : > { %4543 = shalt.err (!%p4540_p11)
}
  0x92   : > { %s5694_s17 = sld [smem:[#allocation54_spill]]  ;;  %s4555_s26 = scalar_lea.vmem %s821_s27, 1024 }
  0x93   : > { %p4556_p12 = scmp.ne.s32.totalorder %s821_s27, %s4555_s26  ;;  %p4563_p5 = scmp.lt.s32.totalorder %s821_s27, %s821_s27 }
  0x94   : > { %p4564_p2 = scmp.lt.s32.totalorder %s4555_s26, %s4555_s26 }
  0x95   : > { %p4558_p0 = pnand %p4556_p12, %p4961_p7 }
  0x96   : > { %p4565_p8 = por %p4564_p2, %p4563_p5 }
  0x97   : > { %p4559_p13 = pneg %p4558_p0 }
  0x98   : > { %4039 = dma.hbm_to_vmem [thread:$0]  (!%p4951_p6), %s5694_s17, 1024, %s789_s24, [#allocation18], %s4756_s1, %s4756_s1, %s4757_s2  }
  0x99   : > { %p4566_p4 = pnand %p4565_p8, %p4559_p13 }
  0x9b   : > { %4569 = shalt.err (!%p4566_p4)
}
  0x9c   : > { %s5695_s21 = sld [smem:[#allocation56_spill]]  ;;  %s3564_s11 = sadd.s32 4294967294, %s4750_s30  }
  0x9d   : > { %s5071_s9 = sadd.s32 1, %s4750_s30   ;;  %s60_s24 = sadd.s32 1, %s4746_s8 }
  0x9e   : > { %5696 = sst [smem:[#allocation36_spill]] %s5071_s9  ;;  %s57_s29 = ssub.s32 %s4750_s30, %s5071_s9 }
  0x9f   : > { %p58_p7 = scmp.eq.s32.totalorder %s57_s29, 0  ;;  %p67_p9 = scmp.ne.s32.totalorder %s4746_s8, %s4742_s4 }
  0xa0   : > { %p68_p10 = scmp.eq.s32.totalorder %s4750_s30, 0  ;;  %p73_p11 = scmp.ne.s32.totalorder %s4742_s4, %s4738_s7 }
  0xa1   : > { %s5082_s5 = scalar_select %p58_p7, %s4746_s8, %s60_s24  }
  0xa2   : > { %4045 = dma.hbm_to_vmem [thread:$0]  (!%p4951_p6), %s5695_s21, 1024, %s821_s27, [#allocation21], %s4756_s1, %s4756_s1, %s4757_s2  }
  0xa3   : > { %5697 = sst [smem:[#allocation37_spill]] %s5082_s5  ;;  %p5084_p12 = por %p68_p10, %p67_p9 }
  0xa4   : > { %p5090_p6 = por %p5647_p1, %p73_p11  ;;  %p663_p0 = scmp.eq.s32.totalorder %s4935_s28, 1 }
  0xa5   : > { %p669_p13 = scmp.eq.s32.totalorder %s3564_s11, 1  ;;  %p4070_p5 = scmp.lt.s32.totalorder %s4750_s30, 2 }
  0xa6   : > { %s5699_s1 = scalar_select %p5090_p6, 1, 0 }
  0xa7   : > { %s5097_s2 = sand.u32 1, %s4746_s8   ;;  %p5099_p2 = por %p663_p0, %p67_p9 }
  0xa8   : > { %p5103_p8 = por %p669_p13, %p73_p11  ;;  %s5646_s3 = sshll.u32 %s5097_s2, 3 }
  0xa9   : > { %s5700_s27 = scalar_select %p5099_p2, 1, 0 }
  0xaa   : > { %s5702_s23 = scalar_select %p5103_p8, 1, 0 }
  0xab   : > { %5701 = sst [smem:[#allocation38_spill]] %s5700_s27  ;;  %s3578_s26 = sshll.u32 %s4750_s30, 7 }
  0xac   : > { %5703 = sst [smem:[#allocation39_spill]] %s5702_s23  ;;  %s853_s24 = scalar_lea.vmem [#allocation2], %s5646_s3 }
  0xad   : > { %s5704_s29 = sld [smem:[#allocation40_spill]]  ;;  %s860_s13 = sshll.u32 %s853_s24, 4  ;;  %s5116_s13 = int_to_ptr.vmem [resolvable:$true] %s860_s13 }
  0xae   : > { %p5120_p4 = pnand %p4070_p5, %p5084_p12  ;;  %s5706_s21 = sld [smem:[#allocation44_spill]] }
  0xaf   : > { %s850_s5 = scalar_lea.sflag [#allocation3], %s5097_s2 }
  0xb0   : > { %p5135_p9 = pneg %p5120_p4 }
  0xb3   : > { %s5112_s11 = scalar_lea.hbm %s5704_s29, %s3578_s26  ;;  %s4575_s17 = scalar_lea.hbm %s5704_s29, 256 }
  0xb4   : > { %s5127_s6 = scalar_lea.hbm %s5706_s21, %s3578_s26  ;;  %s4570_s8 = scalar_lea.hbm %s5112_s11, 128 }
  0xb5   : > { %p4571_p7 = scmp.ne.s32.totalorder %s5112_s11, %s4570_s8  ;;  %p4576_p12 = scmp.lt.s32.totalorder %s5112_s11, %s5704_s29 }
  0xb6   : > { %p4577_p0 = scmp.lt.s32.totalorder %s4575_s17, %s4570_s8 }
  0xb7   : > { %p4573_p10 = pnand %p5135_p9, %p4571_p7 }
  0xb8   : > { %p4578_p13 = por %p4577_p0, %p4576_p12 }
  0xb9   : > { %p4574_p11 = pneg %p4573_p10 }
  0xbb   : > { %p4579_p5 = pnand %p4578_p13, %p4574_p11 }
  0xbd   : > { %4582 = shalt.err (!%p4579_p5)
}
  0xbe   : > { %s4583_s25 = scalar_lea.vmem %s5116_s13, 128  ;;  %s4766_s9 = smov [#allocation2]  }
  0xbf   : > { %p4584_p1 = scmp.ne.s32.totalorder %s5116_s13, %s4583_s25  ;;  %s4588_s3 = sshll.u32 %s4766_s9, 4  ;;  %s4589_s3 = int_to_ptr.vmem [resolvable:$false] %s4588_s3 }
  0xc0   : > { %s4590_s10 = scalar_lea.vmem %s4589_s3, 256  ;;  %p4591_p8 = scmp.lt.s32.totalorder %s5116_s13, %s4589_s3 }
  0xc1   : > { %p4586_p7 = pnand %p4584_p1, %p5135_p9  ;;  %p4592_p2 = scmp.lt.s32.totalorder %s4590_s10, %s4583_s25 }
  0xc3   : > { %p4587_p10 = pneg %p4586_p7  ;;  %p4593_p6 = por %p4592_p2, %p4591_p8 }
  0xc5   : > { %p4594_p3 = pnand %p4593_p6, %p4587_p10 }
  0xc7   : > { %4597 = shalt.err (!%p4594_p3)
}
  0xc8   : > { %4049 = dma.hbm_to_vmem [thread:$0]  (!%p5120_p4), %s5112_s11, 128, %s5116_s13, %s850_s5  }
  0xc9   : > { %s3579_s8 = sshll.u32 %s4750_s30, 4  ;;  %s870_s17 = scalar_lea.vmem [#allocation5], %s5097_s2 }
  0xca   : > { %s877_s19 = sshll.u32 %s870_s17, 4  ;;  %s5708_s29 = sld [smem:[#allocation41_spill]]  ;;  %s878_s19 = int_to_ptr.vmem [resolvable:$true] %s877_s19 }
  0xcb   : > { %s5709_s25 = sand.u32 1, %s4750_s30  }
  0xcc   : > { %s868_s10 = scalar_lea.sflag [#allocation6], %s5709_s25 }
  0xd0   : > { %s875_s3 = scalar_lea.hbm %s5708_s29, %s3579_s8  ;;  %s4603_s22 = scalar_lea.hbm %s5708_s29, 32 }
  0xd1   : > { %s4598_s23 = scalar_lea.hbm %s875_s3, 16  ;;  %p4604_p2 = scmp.lt.s32.totalorder %s875_s3, %s5708_s29 }
  0xd2   : > { %p4599_p1 = scmp.ne.s32.totalorder %s875_s3, %s4598_s23  ;;  %p4605_p8 = scmp.lt.s32.totalorder %s4603_s22, %s4598_s23 }
  0xd4   : > { %p4601_p3 = pnand %p4599_p1, %p5135_p9  ;;  %p4606_p11 = por %p4605_p8, %p4604_p2 }
  0xd6   : > { %p4602_p6 = pneg %p4601_p3 }
  0xd8   : > { %p4607_p12 = pnand %p4606_p11, %p4602_p6 }
  0xda   : > { %4610 = shalt.err (!%p4607_p12)
}
  0xdb   : > { %s4611_s11 = scalar_lea.vmem %s878_s19, 16  ;;  %s4767_s8 = smov [#allocation5]  }
  0xdc   : > { %p4612_p0 = scmp.ne.s32.totalorder %s878_s19, %s4611_s11  ;;  %s4616_s17 = sshll.u32 %s4767_s8, 4  ;;  %s4617_s17 = int_to_ptr.vmem [resolvable:$false] %s4616_s17 }
  0xdd   : > { %s4618_s9 = scalar_lea.vmem %s4617_s17, 32  ;;  %p4619_p7 = scmp.lt.s32.totalorder %s878_s19, %s4617_s17 }
  0xde   : > { %p4614_p13 = pnand %p4612_p0, %p5135_p9  ;;  %p4620_p10 = scmp.lt.s32.totalorder %s4618_s9, %s4611_s11 }
  0xe0   : > { %p4615_p5 = pneg %p4614_p13  ;;  %p4621_p1 = por %p4620_p10, %p4619_p7 }
  0xe2   : > { %p4622_p3 = pnand %p4621_p1, %p4615_p5 }
  0xe4   : > { %4625 = shalt.err (!%p4622_p3)
}
  0xe5   : > { %4052 = dma.hbm_to_vmem [thread:$0]  (!%p5120_p4), %s875_s3, 16, %s878_s19, %s868_s10  }
  0xe6   : > { %s5710_s22 = sshll.u32 %s5097_s2, 3  ;;  %s5711_s23 = smov %s5709_s25 }
  0xe7   : > { %s894_s7 = scalar_lea.vmem [#allocation8], %s5710_s22  ;;  %s891_s26 = scalar_lea.sflag [#allocation9], %s5711_s23 }
  0xe8   : > { %s901_s27 = sshll.u32 %s894_s7, 4  ;;  %s4626_s25 = scalar_lea.hbm %s5127_s6, 128  ;;  %s902_s27 = int_to_ptr.vmem [resolvable:$true] %s901_s27 }
  0xe9   : > { %p4627_p6 = scmp.ne.s32.totalorder %s5127_s6, %s4626_s25  ;;  %s4631_s11 = scalar_lea.hbm %s5706_s21, 256 }
  0xea   : > { %p4632_p11 = scmp.lt.s32.totalorder %s5127_s6, %s5706_s21  ;;  %p4633_p12 = scmp.lt.s32.totalorder %s4631_s11, %s4626_s25 }
  0xeb   : > { %p4629_p2 = pnand %p4627_p6, %p5135_p9 }
  0xec   : > { %p4634_p0 = por %p4633_p12, %p4632_p11 }
  0xed   : > { %p4630_p8 = pneg %p4629_p2 }
  0xef   : > { %p4635_p13 = pnand %p4634_p0, %p4630_p8 }
  0xf1   : > { %4638 = shalt.err (!%p4635_p13)
}
  0xf2   : > { %s4639_s2 = scalar_lea.vmem %s902_s27, 128  ;;  %s4768_s19 = smov [#allocation8]  }
  0xf3   : > { %p4640_p5 = scmp.ne.s32.totalorder %s902_s27, %s4639_s2  ;;  %s4644_s3 = sshll.u32 %s4768_s19, 4  ;;  %s4645_s3 = int_to_ptr.vmem [resolvable:$false] %s4644_s3 }
  0xf4   : > { %s4646_s10 = scalar_lea.vmem %s4645_s3, 256  ;;  %p4647_p1 = scmp.lt.s32.totalorder %s902_s27, %s4645_s3 }
  0xf5   : > { %p4642_p7 = pnand %p4640_p5, %p5135_p9  ;;  %p4648_p3 = scmp.lt.s32.totalorder %s4646_s10, %s4639_s2 }
  0xf7   : > { %p4643_p10 = pneg %p4642_p7  ;;  %p4649_p6 = por %p4648_p3, %p4647_p1 }
  0xf9   : > { %p4650_p2 = pnand %p4649_p6, %p4643_p10 }
  0xfb   : > { %4653 = shalt.err (!%p4650_p2)
}
  0xfc   : > { %4055 = dma.hbm_to_vmem [thread:$0]  (!%p5120_p4), %s5127_s6, 128, %s902_s27, %s891_s26  }
  0xfd   : > { %p5712_p8 = scmp.ne.s32.totalorder %s5683_s0, 0 }
  0xfe   : > { %s5199_s24 = sand.u32 (!%p5712_p8), 1, %s4742_s4   ;;  %p5713_p9 = scmp.ne.s32.totalorder (!%p5712_p8), %s5699_s1, 0 }
  0xff   : > { %916 = sbr.rel (%p5712_p8) target bundleno = 6366 (0x18de), region = 128  ;;  %s3583_s9 = sshll.u32 (!%p5712_p8), %s5199_s24, 3 }
 0x100   : > { %s919_s22 = scalar_lea.sflag (!%p5712_p8), [#allocation3], %s5199_s24  ;;  %s922_s7 = scalar_lea.vmem (!%p5712_p8), [#allocation2], %s3583_s9 }
 0x104   : > { %4697 = dma.done.wait (%p5713_p9), %s919_s22, 128  }
 0x105   : > { %4699 = vsyncadd (%p5713_p9), %s919_s22, 4294967168  ;;  %s927_s15 = sand.u32 1, %s4935_s28   ;;  %s930_s6 = scalar_lea.vmem [#allocation5], %s5199_s24 }
 0x106   : > { %s928_s0 = scalar_lea.sflag [#allocation6], %s927_s15 }
 0x107   : > { %4701 = dma.done.wait (%p5713_p9), %s928_s0, 16  }
 0x108   : > { %4703 = vsyncadd (%p5713_p9), %s928_s0, 4294967280  ;;  %p5714_p4 = scmp.eq.s32.totalorder %s4935_s28, 0 }
 0x10a   : > { %4705 = dma.done.wait (%p5714_p4), [#allocation6], 16   ;;  %p5715_p11 = pmov %p5714_p4 }
 0x10b   : > { %s940_s27 = scalar_lea.sflag [#allocation9], %s927_s15  ;;  %s5217_s23 = scalar_lea.vmem [#allocation8], %s3583_s9 }
 0x10c   : > { %4707 = vsyncadd (%p5715_p11), [#allocation6], 4294967280 }
 0x10d   : > { %4709 = dma.done.wait (%p5713_p9), %s940_s27, 128  }
 0x10e   : > { %4711 = vsyncadd (%p5713_p9), %s940_s27, 4294967168  ;;  %p5716_p12 = pmov %p5714_p4 }
 0x10f   : > { %p5717_p0 = pmov %p5714_p4 }
 0x110   : > { %4713 = dma.done.wait (%p5716_p12), [#allocation9], 16  }
 0x111   : > { %4715 = vsyncadd (%p5717_p0), [#allocation9], 4294967280  ;;  %p5718_p13 = pmov %p5717_p0 }
 0x112   : > { %p5719_p5 = pmov %p5717_p0 }
 0x113   : > { %4717 = dma.done.wait (%p5718_p13), [#allocation12], 2064  }
 0x114   : > { %4719 = vsyncadd (%p5719_p5), [#allocation12], 4294965232  ;;  %p5720_p7 = pmov %p5717_p0 }
 0x115   : > { %p5721_p10 = pmov %p5717_p0 }
 0x116   : > { %4721 = dma.done.wait (%p5720_p7), [#allocation15], 4096  }
 0x117   : > { %4723 = vsyncadd (%p5721_p10), [#allocation15], 4294963200  ;;  %p5722_p1 = pmov %p5717_p0 }
 0x118   : > { %p5723_p3 = pmov %p5717_p0 }
 0x119   : > { %4725 = dma.done.wait (%p5722_p1), [#allocation18], 3072  }
 0x11a   : > { %4727 = vsyncadd (%p5723_p3), [#allocation18], 4294964224  ;;  %p5724_p6 = pmov %p5717_p0 }
 0x11b   : > { %p5725_p2 = pmov %p5717_p0 }
 0x11c   : > { %4729 = dma.done.wait (%p5724_p6), [#allocation21], 3072  }
 0x11d   : > { %4731 = vsyncadd (%p5725_p2), [#allocation21], 4294964224  ;;  %v4769_v0 = vmov 0   ;;  %v5244_v1 = vld [vmem:[%s922_s7] sm:$0xff]  ;;  %v4158_v15 = vld [vmem:[#allocation14 + $0x70] sm:$0xff]   ;;  %v1119_v56 = vlaneseq  ;;  %s5726_s25 = sld [smem:[#allocation49_spill]] }
 0x11e   : > { %1241 = vmatprep.mubr.bf16.mxu0 %v4769_v0  ;;  %1074 = vadd.xlane.f32.xlu0 %v5244_v1  ;;  %v4132_v2 = vld [vmem:[#allocation13 + $0x74] ss:$8 sps:$4 sm:$0xff]   ;;  %v4134_v3 = vld [vmem:[#allocation13 + $0x70] ss:$8 sps:$4 sm:$0xff]   ;;  %v4135_v4 = vld [vmem:[#allocation13 + $0x64] ss:$8 sps:$4 sm:$0xff]   ;;  %v1100_v28 = vpack.c.bf16 %v5244_v1, %v5244_v1 }
 0x11f   : > { %1209 = vmatprep.subr.bf16.mxu0 %v4132_v2  ;;  %v4137_v5 = vld [vmem:[#allocation13 + $0x60] ss:$8 sps:$4 sm:$0xff]   ;;  %v4138_v6 = vld [vmem:[#allocation13 + $0x54] ss:$8 sps:$4 sm:$0xff]   ;;  %v4140_v7 = vld [vmem:[#allocation13 + $0x50] ss:$8 sps:$4 sm:$0xff]  }
 0x120   : > { %1210 = vmatpush1.bf16.msra.mxu0 %v4134_v3  ;;  %v4141_v8 = vld [vmem:[#allocation13 + $0x44] ss:$8 sps:$4 sm:$0xff]   ;;  %v4143_v9 = vld [vmem:[#allocation13 + $0x40] ss:$8 sps:$4 sm:$0xff]   ;;  %v4144_v10 = vld [vmem:[#allocation13 + $0x34] ss:$8 sps:$4 sm:$0xff]  }
 0x121   : > { %1211 = vmatprep.subr.bf16.mxu0 %v4135_v4  ;;  %v4146_v11 = vld [vmem:[#allocation13 + $0x30] ss:$8 sps:$4 sm:$0xff]   ;;  %v4147_v12 = vld [vmem:[#allocation13 + $0x24] ss:$8 sps:$4 sm:$0xff]   ;;  %v4149_v16 = vld [vmem:[#allocation13 + $0x20] ss:$8 sps:$4 sm:$0xff]  }
 0x122   : > { %v4156_v13 = vld [vmem:[#allocation14 + $0x78] sm:$0xff]   ;;  %v4159_v18 = vld [vmem:[#allocation14 + $0x30] sm:$0xff]   ;;  %v4160_v19 = vld [vmem:[#allocation14 + $0x68] sm:$0xff]   ;;  %v1120_v57 = vshrl.u32 %v1119_v56, 7  ;;  %s5727_s11 = sld [smem:[#allocation51_spill]]  ;;  %vm4771_vm0 = vmmov 0  }
 0x123   : > { %v4157_v14 = vld [vmem:[#allocation14 + $0x38] sm:$0xff]   ;;  %3755 = vmatprep.subr.bf16.mxu1 %v4156_v13  ;;  %v4161_v21 = vld [vmem:[#allocation14 + $0x28] sm:$0xff]   ;;  %v4162_v23 = vld [vmem:[#allocation14 + $0x60] sm:$0xff]   ;;  %vm1741_vm1 = vcmask 523264   ;;  %s4772_s9 = smov 64   ;;  %vm1812_vm2 = vcmask 1043456  }
 0x124   : > { %1212 = vmatpush1.bf16.msra.mxu0 %v4137_v5  ;;  %v4150_v17 = vld [vmem:[#allocation13 + $0x14] ss:$8 sps:$4 sm:$0xff]   ;;  %3756 = vmatpush3.bf16.msra.mxu1 %v4157_v14  ;;  %v4152_v20 = vld [vmem:[#allocation13 + $0x10] ss:$8 sps:$4 sm:$0xff]   ;;  %v4153_v22 = vld [vmem:[#allocation13 + $0x4] ss:$8 sps:$4 sm:$0xff]  }
 0x125   : > { %1213 = vmatprep.subr.bf16.mxu0 %v4138_v6  ;;  %3757 = vmatprep.subr.bf16.mxu1 %v4158_v15  ;;  %v4155_v24 = vld [vmem:[#allocation13] ss:$8 sps:$4 sm:$0xff]   ;;  %v4164_v26 = vld [vmem:[#allocation14 + $0x58] sm:$0xff]   ;;  %v4166_v29 = vld [vmem:[#allocation14 + $0x50] sm:$0xff]   ;;  %v5282_v58 = vsub.s32 0, %v1120_v57  ;;  %v5287_v60 = vsub.s32 1, %v1120_v57 }
 0x126   : > { %v4163_v25 = vld [vmem:[#allocation14 + $0x20] sm:$0xff]   ;;  %v4165_v27 = vld [vmem:[#allocation14 + $0x18] sm:$0xff]   ;;  %v4167_v30 = vld [vmem:[#allocation14 + $0x10] sm:$0xff]   ;;  %vm1796_vm3 = vcmask 64512   ;;  %p1064_p8 = scmp.lt.s32.totalorder %s4935_s28, 1  ;;  %s5728_s26 = sld [smem:[#allocation57_spill]] }
 0x127   : > { %v4168_v31 = vld [vmem:[#allocation14 + $0x48] sm:$0xff]   ;;  %v4170_v33 = vld [vmem:[#allocation14 + $0x40] sm:$0xff]   ;;  %v5250_v35 = vld [vmem:[#allocation16 + $0x70] ss:$8 sps:$4 sm:$0xff]   ;;  %s5729_s5 = sld [smem:[#allocation43_spill]]  ;;  %vm2664_vm4 = vcmask 1040384  }
 0x128   : > { %1214 = vmatpush1.bf16.msra.mxu0 %v4140_v7  ;;  %3758 = vmatpush3.bf16.msra.mxu1 %v4159_v18  ;;  %v4169_v32 = vld [vmem:[#allocation14 + $0x8] sm:$0xff]   ;;  %v4171_v34 = vld [vmem:[#allocation14] sm:$0xff]   ;;  %v5252_v36 = vld [vmem:[#allocation16 + $0x74] ss:$8 sps:$4 sm:$0xff]   ;;  %s5730_s17 = sld [smem:[#allocation58_spill]]  ;;  %vm3026_vm5 = vcmask 57344  }
 0x129   : > { %1215 = vmatprep.subr.bf16.mxu0 %v4141_v8  ;;  %3759 = vmatprep.subr.bf16.mxu1 %v4160_v19  ;;  %v5254_v37 = vld [vmem:[#allocation16 + $0x64] ss:$8 sps:$4 sm:$0xff]   ;;  %v5258_v38 = vld [vmem:[#allocation16 + $0x60] ss:$8 sps:$4 sm:$0xff]   ;;  %v5267_v43 = vld [vmem:[#allocation16 + $0x54] ss:$8 sps:$4 sm:$0xff]  }
 0x12a   : > { %v5269_v44 = vld [vmem:[#allocation16 + $0x50] ss:$8 sps:$4 sm:$0xff]   ;;  %v5273_v45 = vld [vmem:[#allocation16 + $0x40] ss:$8 sps:$4 sm:$0xff]   ;;  %v5275_v46 = vld [vmem:[#allocation16 + $0x44] ss:$8 sps:$4 sm:$0xff]  }
 0x12b   : > { %v4186_v47 = vld [vmem:[#allocation16 + $0x34] ss:$8 sps:$4 sm:$0xff]   ;;  %v4184_v48 = vld [vmem:[#allocation16 + $0x30] ss:$8 sps:$4 sm:$0xff]   ;;  %v4189_v49 = vld [vmem:[#allocation16 + $0x24] ss:$8 sps:$4 sm:$0xff]  }
 0x12c   : > { %1216 = vmatpush1.bf16.msra.mxu0 %v4143_v9  ;;  %3760 = vmatpush3.bf16.msra.mxu1 %v4161_v21  ;;  %v4187_v50 = vld [vmem:[#allocation16 + $0x20] ss:$8 sps:$4 sm:$0xff]   ;;  %v4192_v51 = vld [vmem:[#allocation16 + $0x14] ss:$8 sps:$4 sm:$0xff]   ;;  %v4190_v52 = vld [vmem:[#allocation16 + $0x10] ss:$8 sps:$4 sm:$0xff]  }
 0x12d   : > { %1217 = vmatprep.subr.bf16.mxu0 %v4144_v10  ;;  %3761 = vmatprep.subr.bf16.mxu1 %v4162_v23  ;;  %v4195_v53 = vld [vmem:[#allocation16 + $0x4] ss:$8 sps:$4 sm:$0xff]   ;;  %v4193_v54 = vld [vmem:[#allocation16] ss:$8 sps:$4 sm:$0xff]   ;;  %v5279_v55 = vld [vmem:[#allocation17 + $0x74] ss:$8 sps:$4 sm:$0xff]  }
 0x12e   : > { %v1117_v59 = vld [vmem:[%s5726_s25] sm:$0x3]  ;;  %v5300_v13 = vld [vmem:[#allocation17 + $0x54] ss:$8 sps:$4 sm:$0xff]   ;;  %v5306_v15 = vld [vmem:[#allocation17 + $0x44] ss:$8 sps:$4 sm:$0xff]  }
 0x12f   : > { %v1122_v61 = vrot.slane %v1117_v59, %v5282_v58  ;;  %v1126_v62 = vrot.slane %v1117_v59, %v5287_v60  ;;  %v5291_v9 = vld [vmem:[#allocation17 + $0x70] ss:$8 sps:$4 sm:$0xff]   ;;  %v5318_v19 = vld [vmem:[#allocation17 + $0x24] ss:$8 sps:$4 sm:$0xff]   ;;  %s5731_s3 = sld [smem:[#allocation59_spill]]  ;;  %s3752_s2 = sshll.u32 %s4935_s28, 4 }
 0x130   : > { %1218 = vmatpush1.bf16.msra.mxu0 %v4146_v11  ;;  %3762 = vmatpush3.bf16.msra.mxu1 %v4163_v25  ;;  %v5293_v11 = vld [vmem:[#allocation17 + $0x64] ss:$8 sps:$4 sm:$0xff]   ;;  %v5303_v14 = vld [vmem:[#allocation17 + $0x50] ss:$8 sps:$4 sm:$0xff]   ;;  %v3595_v25 = vld [vmem:[#allocation10] ss:$0 sm:$0xff] }
 0x131   : > { %1219 = vmatprep.subr.bf16.mxu0 %v4147_v12  ;;  %3763 = vmatprep.subr.bf16.mxu1 %v4164_v26  ;;  %v5296_v12 = vld [vmem:[#allocation17 + $0x60] ss:$8 sps:$4 sm:$0xff]   ;;  %v5315_v18 = vld [vmem:[#allocation17 + $0x30] ss:$8 sps:$4 sm:$0xff]   ;;  %s5732_s1 = sld [smem:[#allocation45_spill]]  ;;  %s1063_s19 = scalar_lea.vmem [#allocation23], %s5199_s24 }
 0x132   : > { %s5736_s7 = sld [smem:[#allocation62_spill]]  ;;  %s3331_s27 = scalar_lea.sflag [#allocation4], %s5199_s24 }
 0x134   : > { %1220 = vmatpush1.bf16.msra.mxu0 %v4149_v16  ;;  %3764 = vmatpush3.bf16.msra.mxu1 %v4165_v27  ;;  %v5309_v16 = vld [vmem:[#allocation17 + $0x40] ss:$8 sps:$4 sm:$0xff]   ;;  %v3596_v27 = vld [vmem:[#allocation11] ss:$0 sm:$0xff] }
 0x135   : > { %1221 = vmatprep.subr.bf16.mxu0 %v4150_v17  ;;  %3765 = vmatprep.subr.bf16.mxu1 %v4166_v29  ;;  %v5312_v17 = vld [vmem:[#allocation17 + $0x34] ss:$8 sps:$4 sm:$0xff]  }
 0x138   : > { %1222 = vmatpush1.bf16.msra.mxu0 %v4152_v20  ;;  %3766 = vmatpush3.bf16.msra.mxu1 %v4167_v30  ;;  %v5321_v20 = vld [vmem:[#allocation17 + $0x20] ss:$8 sps:$4 sm:$0xff]   ;;  %v5328_v30 = vld [vmem:[#allocation17 + $0x10] ss:$8 sps:$4 sm:$0xff]   ;;  %s5737_s15 = smov %s5736_s7  ;;  %s3341_s0 = scalar_lea.hbm %s5736_s7, %s3752_s2 }
 0x139   : > { %1223 = vmatprep.subr.bf16.mxu0 %v4153_v22  ;;  %3767 = vmatprep.subr.bf16.mxu1 %v4168_v31 }
 0x13c   : > { %1224 = vmatpush1.bf16.msra.mxu0 %v4155_v24  ;;  %3768 = vmatpush3.bf16.msra.mxu1 %v4169_v32  ;;  %v5334_v32 = vld [vmem:[#allocation17 + $0x4] ss:$8 sps:$4 sm:$0xff]  }
 0x13d   : > { %3769 = vmatprep.subr.bf16.mxu1 %v4170_v33  ;;  %1546 = vmatprep.subr.bf16.mxu0 %v5252_v36 }
 0x13f   : > { %1242 = vmatmul.mubr.bf16.vlgmr.msra.gmra.mxu0 %v1100_v28  ;;  %v5326_v28 = vld [vmem:[#allocation17 + $0x14] ss:$8 sps:$4 sm:$0xff]  }
 0x140   : > { %1578 = vmatprep.mubr.bf16.mxu0 %v4769_v0  ;;  %3770 = vmatpush3.bf16.msra.mxu1 %v4171_v34  ;;  %v5338_v34 = vld [vmem:[#allocation17] ss:$8 sps:$4 sm:$0xff]  }
 0x141   : > { %1547 = vmatpush1.bf16.msra.mxu0 %v5250_v35  ;;  %1696 = vmatprep.subr.bf16.mxu1 %v5279_v55 }
 0x142   : > { %1548 = vmatprep.subr.bf16.mxu0 %v5254_v37 }
 0x145   : > { %1549 = vmatpush1.bf16.msra.mxu0 %v5258_v38 }
 0x146   : > { %1550 = vmatprep.subr.bf16.mxu0 %v5267_v43 }
 0x149   : > { %1551 = vmatpush1.bf16.msra.mxu0 %v5269_v44 }
 0x14a   : > { %1552 = vmatprep.subr.bf16.mxu0 %v5275_v46 }
 0x14d   : > { %1553 = vmatpush1.bf16.msra.mxu0 %v5273_v45 }
 0x14e   : > { %1554 = vmatprep.subr.bf16.mxu0 %v4186_v47  ;;  %v3630_v47 = vld [vmem:[%s5625_s12] ss:$0 sm:$0xff] }
 0x151   : > { %1555 = vmatpush1.bf16.msra.mxu0 %v4184_v48 }
 0x152   : > { %1556 = vmatprep.subr.bf16.mxu0 %v4189_v49 }
 0x155   : > { %1557 = vmatpush1.bf16.msra.mxu0 %v4187_v50 }
 0x156   : > { %1558 = vmatprep.subr.bf16.mxu0 %v4192_v51 }
 0x159   : > { %1559 = vmatpush1.bf16.msra.mxu0 %v4190_v52 }
 0x15a   : > { %1560 = vmatprep.subr.bf16.mxu0 %v4195_v53  ;;  %v1454_v53 = vld [vmem:[%s5627_s14] sm:$0x3] }
 0x15d   : > { %1561 = vmatpush1.bf16.msra.mxu0 %v4193_v54  ;;  %v1463_v54 = vrot.slane %v1454_v53, %v5287_v60 }
 0x1a7   : > { %v1075_v39 = vpop.xlane.xlu0 %1074 }
 0x1a8   : > { %v1077_v40 = vmul.f32 0.0078125, %v1075_v39 }
 0x1aa   : > { %v5263_v41 = vsub.f32 %v5244_v1, %v1077_v40  ;;  %v3613_v40 = vld [vmem:[%s5727_s11] ss:$0 sm:$0xff] }
 0x1ac   : > { %v1079_v42 = vmul.f32 %v5263_v41, %v5263_v41 }
 0x1ae   : > { %1080 = vadd.xlane.f32.xlu0 %v1079_v42 }
 0x1ff   : > { %v1243_v63 = vpop.f32.mrf.mxu0 }
 0x200   : > { %v1244_v1 = vadd.f32 %v1243_v63, %v1122_v61  ;;  %v4770_v63 = vmov 0.0  }
 0x201   : > { %v1245_v2 = vpop.f32.mrf.mxu0  ;;  %3830 = vmatprep.subr.bf16.mxu0 %v4770_v63 }
 0x202   : > { %v1246_v3 = vadd.f32 %v1245_v2, %v1126_v62  ;;  %v1250_v4 = vmax.f32 %v1244_v1, 0.0  ;;  %v1604_v1 = vld [vmem:[%s5629_s16] sm:$0x3] }
 0x203   : > { %v1247_v5 = vpop.f32.mrf.mxu0  ;;  %v1609_v2 = vrot.slane %v1604_v1, %v5282_v58 }
 0x204   : > { %v1251_v6 = vmax.f32 %v1246_v3, 0.0  ;;  %v1252_v10 = vpack.c.bf16 %v1250_v4, %v1250_v4  ;;  %v1613_v5 = vrot.slane %v1604_v1, %v5287_v60 }
 0x205   : > { %v1248_v7 = vpop.f32.mrf.mxu0 }
 0x206   : > { %v1253_v8 = vpack.c.bf16 %v1251_v6, %v1251_v6  ;;  %v1459_v7 = vrot.slane %v1454_v53, %v5282_v58 }
 0x208   : > { %1421 = vmatprep.mubr.bf16.mxu1 %v1253_v8 }
 0x209   : > { %1422 = vmatmul.mubr.bf16.vlgmr.msra.gmra.mxu1 %v1252_v10 }
 0x20a   : > { %1697 = vmatpush1.bf16.msra.mxu1 %v5291_v9  ;;  %1728 = vmatprep.mubr.bf16.mxu1 %v4769_v0 }
 0x20b   : > { %1698 = vmatprep.subr.bf16.mxu1 %v5293_v11 }
 0x20e   : > { %1699 = vmatpush1.bf16.msra.mxu1 %v5296_v12 }
 0x20f   : > { %1700 = vmatprep.subr.bf16.mxu1 %v5300_v13 }
 0x212   : > { %1701 = vmatpush1.bf16.msra.mxu1 %v5303_v14 }
 0x213   : > { %1702 = vmatprep.subr.bf16.mxu1 %v5306_v15 }
 0x216   : > { %1703 = vmatpush1.bf16.msra.mxu1 %v5309_v16 }
 0x217   : > { %1704 = vmatprep.subr.bf16.mxu1 %v5312_v17 }
 0x21a   : > { %1705 = vmatpush1.bf16.msra.mxu1 %v5315_v18 }
 0x21b   : > { %1706 = vmatprep.subr.bf16.mxu1 %v5318_v19 }
 0x21e   : > { %1707 = vmatpush1.bf16.msra.mxu1 %v5321_v20 }
 0x21f   : > { %1708 = vmatprep.subr.bf16.mxu1 %v5326_v28 }
 0x222   : > { %1709 = vmatpush1.bf16.msra.mxu1 %v5328_v30 }
 0x223   : > { %1710 = vmatprep.subr.bf16.mxu1 %v5334_v32 }
 0x226   : > { %1711 = vmatpush1.bf16.msra.mxu1 %v5338_v34 }
 0x227   : > { %3848 = vmatprep.subr.bf16.mxu1 %v4770_v63 }
 0x237   : > { %v1081_v21 = vpop.xlane.xlu0 %1080 }
 0x238   : > { %v1082_v22 = vmul.f32 0.0078125, %v1081_v21 }
 0x23a   : > { %v1083_v23 = vadd.f32 1e-08, %v1082_v22 }
 0x23c   : > { %4280 = vrsqrt.f32 %v1083_v23 }
 0x249   : > { %v4281_v24 = vpop.eup %4280 }
 0x24a   : > { %v1085_v26 = vmul.f32 %v4281_v24, %v5263_v41 }
 0x24c   : > { %v1092_v29 = vmul.f32 %v3595_v25, %v1085_v26 }
 0x24e   : > { %v5331_v31 = vadd.f32 %v3596_v27, %v1092_v29 }
 0x250   : > { %v1437_v33 = vpack.c.bf16 %v5331_v31, %v5331_v31 }
 0x252   : > { %1579 = vmatmul.mubr.bf16.vlgmr.msra.gmra.mxu0 %v1437_v33  ;;  %v3664_v33 = vld [vmem:[#allocation7] ss:$0 sm:$0xff] }
 0x253   : > { %3832 = vmatprep.mubr.msk.bf16.mxu0 %vm4771_vm0, %v4770_v63 }
 0x2c9   : > { %v3771_v39 = vpop.f32.mrf.mxu1 }
 0x2cb   : > { %v3772_v41 = vpop.f32.mrf.mxu1 }
 0x2cc   : > { %v3773_v42 = vadd.f32 %v3772_v41, %v3771_v39 }
 0x2cd   : > { %v3774_v48 = vpop.f32.mrf.mxu1 }
 0x2ce   : > { %v1424_v49 = vadd.f32 %v3773_v42, %v3613_v40 }
 0x2cf   : > { %v3775_v50 = vpop.f32.mrf.mxu1 }
 0x2d0   : > { %v1436_v51 = vmul.f32 %v3630_v47, %v1424_v49 }
 0x2d2   : > { %v1587_v52 = vpack.c.bf16 %v1436_v51, %v1436_v51 }
 0x2d4   : > { %1729 = vmatmul.mubr.bf16.vlgmr.msra.gmra.mxu1 %v1587_v52 }
 0x2d5   : > { %3850 = vmatprep.mubr.msk.bf16.mxu1 %vm4771_vm0, %v4770_v63 }
 0x312   : > { %v1580_v56 = vpop.f32.mrf.mxu0 }
 0x313   : > { %v1581_v24 = vadd.f32 %v1580_v56, %v1459_v7 }
 0x314   : > { %v1582_v57 = vpop.f32.mrf.mxu0 }
 0x315   : > { %v5352_v59 = vadd.f32 %v1582_v57, %v1463_v54  ;;  %v1738_v26 = vpack.c.bf16 %v1581_v24, %v1581_v24 }
 0x316   : > { %v1584_v61 = vpop.f32.mrf.mxu0 }
 0x318   : > { %v1585_v62 = vpop.f32.mrf.mxu0 }
 0x394   : > { %v1730_v3 = vpop.f32.mrf.mxu1 }
 0x395   : > { %v1731_v4 = vadd.f32 %v1730_v3, %v1609_v2 }
 0x396   : > { %v1732_v6 = vpop.f32.mrf.mxu1 }
 0x397   : > { %v1739_v8 = vpack.c.bf16 %v1731_v4, %v1731_v4  ;;  %v1733_v22 = vadd.f32 %v1732_v6, %v1613_v5 }
 0x398   : > { %v1734_v10 = vpop.f32.mrf.mxu1 }
 0x399   : > { %v1746_v21 = vsel %vm1741_vm1, %v1739_v8, 0  ;;  %1860 = vrot.lane.b32.xlu0 %v1739_v8, %s4772_s9  ;;  %v1740_v25 = vpack.c.bf16 %v1733_v22, %v1733_v22 }
 0x39a   : > { %v1735_v23 = vpop.f32.mrf.mxu1  ;;  %3831 = vmatpush3.bf16.xpose.msra.mxu0 %v1746_v21 }
 0x39b   : > { %3836 = vmatprep.subr.bf16.mxu0 %v4770_v63  ;;  %v1814_v27 = vsel %vm1812_vm2, %v1740_v25, 0 }
 0x3a1   : > { %3833 = vmatmul.mubr.msk.bf16.vlgmr.msra.gmra.mxu0 %vm1741_vm1, %v1738_v26 }
 0x3a2   : > { %3837 = vmatpush3.bf16.msra.mxu0 %v1814_v27  ;;  %3838 = vmatprep.mubr.msk.bf16.mxu0 %vm4771_vm0, %v4770_v63 }
 0x3a3   : > { %3842 = vmatprep.subr.bf16.mxu0 %v4770_v63 }
 0x40b   : > { %v1861_v61 = vpop.permute.xlu0 %1860 }
 0x40c   : > { %v1866_v1 = vsel %vm1741_vm1, %v1861_v61, 0  ;;  %v4228_v61 = vld [vmem:[#allocation20 + $0x70] ss:$8 sps:$4 sm:$0xff]  }
 0x461   : > { %v1782_v29 = vpop.f32.mrf.mxu0 }
 0x462   : > { %v1788_v39 = vmul.f32 0.125, %v1782_v29 }
 0x463   : > { %v3834_v40 = vpop.f32.mrf.mxu0 }
 0x464   : > { %v1795_v41 = vadd.f32 %v3664_v33, %v1788_v39 }
 0x465   : > { %v1785_v42 = vpop.f32.mrf.mxu0 }
 0x466   : > { %v1797_v47 = vsel %vm1796_vm3, %v1795_v41, -inf }
 0x467   : > { %1798 = vmax.xlane.f32.xlu1 %v1797_v47  ;;  %v3835_v48 = vpop.f32.mrf.mxu0 }
 0x4f0   : > { %v1799_v49 = vpop.xlane.xlu1 %1798 }
 0x4f1   : > { %v1800_v50 = vsub.f32 %v1795_v41, %v1799_v49 }
 0x4f3   : > { %v1801_v51 = vmul.f32 1.442695, %v1800_v50  ;;  %v4220_v50 = vld [vmem:[#allocation19 + $0x38] sm:$0xff]  }
 0x4f5   : > { %4282 = vpow2.f32 %v1801_v51  ;;  %v4221_v51 = vld [vmem:[#allocation19 + $0x30] sm:$0xff]  }
 0x502   : > { %v4283_v52 = vpop.eup %4282 }
 0x503   : > { %v1803_v53 = vsel %vm1796_vm3, %v4283_v52, 0.0 }
 0x504   : > { %1804 = vadd.xlane.f32.xlu1 %v1803_v53  ;;  %v4224_v53 = vld [vmem:[#allocation19 + $0x18] sm:$0xff]  }
 0x515   : > { %1857 = vrot.lane.b32.xlu1 %v1738_v26, %s4772_s9 }
 0x58d   : > { %v1805_v54 = vpop.xlane.xlu1 %1804 }
 0x58e   : > { %4284 = vrcp.f32 %v1805_v54  ;;  %v4225_v54 = vld [vmem:[#allocation19 + $0x10] sm:$0xff]  }
 0x591   : > { %v1858_v2 = vpop.permute.xlu1 %1857 }
 0x59b   : > { %v4285_v56 = vpop.eup %4284 }
 0x59c   : > { %v1807_v57 = vmul.f32 %v4285_v56, %v4283_v52  ;;  %v4223_v52 = vld [vmem:[#allocation19 + $0x20] sm:$0xff]   ;;  %v4226_v56 = vld [vmem:[#allocation19 + $0x8] sm:$0xff]  }
 0x59e   : > { %v1808_v62 = vpack.c.bf16 %v1807_v57, %v1807_v57  ;;  %v4227_v57 = vld [vmem:[#allocation19] sm:$0xff]  }
 0x5a0   : > { %3839 = vmatmul.mubr.msk.bf16.vlgmr.msra.gmra.mxu0 %vm1796_vm3, %v1808_v62  ;;  %v4230_v62 = vld [vmem:[#allocation20 + $0x74] ss:$8 sps:$4 sm:$0xff]  }
 0x5a1   : > { %3843 = vmatpush3.bf16.xpose.msra.mxu0 %v1866_v1  ;;  %3844 = vmatprep.mubr.msk.bf16.mxu0 %vm4771_vm0, %v4770_v63  ;;  %v4233_v1 = vld [vmem:[#allocation20 + $0x64] ss:$8 sps:$4 sm:$0xff]  }
 0x5a2   : > { %3854 = vmatprep.subr.bf16.mxu0 %v4770_v63 }
 0x5a8   : > { %3845 = vmatmul.mubr.msk.bf16.vlgmr.msra.gmra.mxu0 %vm1741_vm1, %v1858_v2  ;;  %v4231_v2 = vld [vmem:[#allocation20 + $0x60] ss:$8 sps:$4 sm:$0xff]  }
 0x5a9   : > { %3870 = vmatprep.mubr.msk.bf16.mxu0 %vm4771_vm0, %v4770_v63  ;;  %3855 = vmatpush3.bf16.msra.mxu0 %v4220_v50 }
 0x5aa   : > { %3856 = vmatprep.subr.bf16.mxu0 %v4770_v63 }
 0x5ad   : > { %3857 = vmatpush3.bf16.msra.mxu0 %v4221_v51 }
 0x5ae   : > { %3858 = vmatprep.subr.bf16.mxu0 %v4770_v63 }
 0x660   : > { %v5385_v3 = vpop.f32.mrf.mxu0 }
 0x662   : > { %v3840_v4 = vpop.f32.mrf.mxu0 }
 0x663   : > { %v4236_v4 = vld [vmem:[#allocation20 + $0x54] ss:$8 sps:$4 sm:$0xff]  }
 0x664   : > { %v1853_v5 = vpop.f32.mrf.mxu0 }
 0x665   : > { %v4234_v5 = vld [vmem:[#allocation20 + $0x50] ss:$8 sps:$4 sm:$0xff]  }
 0x666   : > { %v3841_v6 = vpop.f32.mrf.mxu0 }
 0x667   : > { %v4239_v6 = vld [vmem:[#allocation20 + $0x44] ss:$8 sps:$4 sm:$0xff]  }
 0x668   : > { %v1902_v7 = vpop.f32.mrf.mxu0 }
 0x669   : > { %v1908_v8 = vmul.f32 0.125, %v1902_v7 }
 0x66a   : > { %v3846_v10 = vpop.f32.mrf.mxu0 }
 0x66b   : > { %v1909_v21 = vadd.f32 %v3664_v33, %v1908_v8  ;;  %v4237_v10 = vld [vmem:[#allocation20 + $0x40] ss:$8 sps:$4 sm:$0xff]  }
 0x66c   : > { %v1905_v22 = vpop.f32.mrf.mxu0 }
 0x66d   : > { %v1910_v23 = vsel %vm1796_vm3, %v1909_v21, -inf }
 0x66e   : > { %1911 = vmax.xlane.f32.xlu1 %v1910_v23  ;;  %v3847_v24 = vpop.f32.mrf.mxu0 }
 0x66f   : > { %v4240_v24 = vld [vmem:[#allocation20 + $0x30] ss:$8 sps:$4 sm:$0xff]  }
 0x6f7   : > { %v1912_v26 = vpop.xlane.xlu1 %1911 }
 0x6f8   : > { %v1913_v27 = vsub.f32 %v1909_v21, %v1912_v26  ;;  %v4242_v21 = vld [vmem:[#allocation20 + $0x34] ss:$8 sps:$4 sm:$0xff]   ;;  %v4245_v26 = vld [vmem:[#allocation20 + $0x24] ss:$8 sps:$4 sm:$0xff]  }
 0x6fa   : > { %v1914_v29 = vmul.f32 1.442695, %v1913_v27  ;;  %v4243_v27 = vld [vmem:[#allocation20 + $0x20] ss:$8 sps:$4 sm:$0xff]  }
 0x6fc   : > { %4286 = vpow2.f32 %v1914_v29  ;;  %v4248_v29 = vld [vmem:[#allocation20 + $0x14] ss:$8 sps:$4 sm:$0xff]  }
 0x709   : > { %v4287_v39 = vpop.eup %4286 }
 0x70a   : > { %v1916_v40 = vsel %vm1796_vm3, %v4287_v39, 0.0 }
 0x70b   : > { %1917 = vadd.xlane.f32.xlu0 %v1916_v40 }
 0x721   : > { %1923 = vrot.lane.b32.xlu0 %v1740_v25, %s4772_s9  ;;  %v4222_v25 = vld [vmem:[#allocation19 + $0x28] sm:$0xff]  }
 0x722   : > { %3859 = vmatpush3.bf16.msra.mxu0 %v4222_v25 }
 0x723   : > { %3860 = vmatprep.subr.bf16.mxu0 %v4770_v63 }
 0x726   : > { %3861 = vmatpush3.bf16.msra.mxu0 %v4223_v52 }
 0x727   : > { %3862 = vmatprep.subr.bf16.mxu0 %v4770_v63 }
 0x72a   : > { %3863 = vmatpush3.bf16.msra.mxu0 %v4224_v53  ;;  %v2105_v53 = vld [vmem:[%s5633_s20] sm:$0x3] }
 0x72b   : > { %3864 = vmatprep.subr.bf16.mxu0 %v4770_v63 }
 0x72e   : > { %3865 = vmatpush3.bf16.msra.mxu0 %v4225_v54  ;;  %v2110_v54 = vrot.slane %v2105_v53, %v5282_v58 }
 0x72f   : > { %3866 = vmatprep.subr.bf16.mxu0 %v4770_v63 }
 0x732   : > { %3867 = vmatpush3.bf16.msra.mxu0 %v4226_v56  ;;  %v2114_v56 = vrot.slane %v2105_v53, %v5287_v60 }
 0x733   : > { %3868 = vmatprep.subr.bf16.mxu0 %v4770_v63 }
 0x736   : > { %3869 = vmatpush3.bf16.msra.mxu0 %v4227_v57 }
 0x737   : > { %3874 = vmatprep.subr.bf16.mxu0 %v4770_v63 }
 0x794   : > { %v1918_v41 = vpop.xlane.xlu0 %1917 }
 0x795   : > { %4288 = vrcp.f32 %v1918_v41 }
 0x798   : > { %v1924_v42 = vpop.permute.xlu0 %1923 }
 0x799   : > { %v1929_v33 = vsel %vm1812_vm2, %v1924_v42, 0 }
 0x79a   : > { %3849 = vmatpush3.bf16.msra.mxu1 %v1929_v33  ;;  %v4251_v33 = vld [vmem:[#allocation20 + $0x4] ss:$8 sps:$4 sm:$0xff]  }
 0x79b   : > { %2197 = vmatprep.subr.bf16.mxu1 %v4230_v62 }
 0x7a2   : > { %v4289_v47 = vpop.eup %4288 }
 0x7a3   : > { %v1920_v48 = vmul.f32 %v4289_v47, %v4287_v39  ;;  %v4246_v39 = vld [vmem:[#allocation20 + $0x10] ss:$8 sps:$4 sm:$0xff]   ;;  %v4249_v47 = vld [vmem:[#allocation20] ss:$8 sps:$4 sm:$0xff]  }
 0x7a5   : > { %v1921_v49 = vpack.c.bf16 %v1920_v48, %v1920_v48  ;;  %v3668_v48 = vld [vmem:[%s5631_s18] ss:$0 sm:$0xff] }
 0x7a7   : > { %3851 = vmatmul.mubr.msk.bf16.vlgmr.msra.gmra.mxu1 %vm1796_vm3, %v1921_v49 }
 0x7a8   : > { %2229 = vmatprep.mubr.bf16.mxu1 %v4769_v0  ;;  %2198 = vmatpush1.bf16.msra.mxu1 %v4228_v61 }
 0x7a9   : > { %2199 = vmatprep.subr.bf16.mxu1 %v4233_v1 }
 0x7ac   : > { %2200 = vmatpush1.bf16.msra.mxu1 %v4231_v2 }
 0x7ad   : > { %2201 = vmatprep.subr.bf16.mxu1 %v4236_v4 }
 0x7b0   : > { %2202 = vmatpush1.bf16.msra.mxu1 %v4234_v5 }
 0x7b1   : > { %2203 = vmatprep.subr.bf16.mxu1 %v4239_v6 }
 0x7b4   : > { %2204 = vmatpush1.bf16.msra.mxu1 %v4237_v10 }
 0x7b5   : > { %2205 = vmatprep.subr.bf16.mxu1 %v4242_v21 }
 0x7b8   : > { %2206 = vmatpush1.bf16.msra.mxu1 %v4240_v24  ;;  %v3694_v24 = vld [vmem:[%s930_s6] ss:$0 sm:$0xff]  ;;  %s5477_s6 = scalar_select %p1064_p8, %s4935_s28, 1 }
 0x7b9   : > { %2207 = vmatprep.subr.bf16.mxu1 %v4245_v26 }
 0x7ba   : > { %s1066_s11 = scalar_lea.vmem %s5729_s5, %s5477_s6  ;;  %s5733_s5 = sld [smem:[#allocation60_spill]] }
 0x7bc   : > { %2208 = vmatpush1.bf16.msra.mxu1 %v4243_v27 }
 0x7bd   : > { %2209 = vmatprep.subr.bf16.mxu1 %v4248_v29 }
 0x7c0   : > { %2210 = vmatpush1.bf16.msra.mxu1 %v4246_v39 }
 0x7c1   : > { %2211 = vmatprep.subr.bf16.mxu1 %v4251_v33 }
 0x7c4   : > { %2212 = vmatpush1.bf16.msra.mxu1 %v4249_v47 }
 0x7c5   : > { %3880 = vmatprep.subr.bf16.mxu1 %v4770_v63 }
 0x867   : > { %v1965_v7 = vpop.f32.mrf.mxu1 }
 0x868   : > { %1972 = vrot.lane.b32.xlu1 %v1965_v7, %s4772_s9 }
 0x869   : > { %v3852_v8 = vpop.f32.mrf.mxu1 }
 0x86a   : > { %v2239_v8 = vpack.c.bf16 %v5352_v59, %v5352_v59 }
 0x86b   : > { %v1968_v22 = vpop.f32.mrf.mxu1 }
 0x86d   : > { %v3853_v23 = vpop.f32.mrf.mxu1 }
 0x8da   : > { %v1973_v40 = vpop.permute.xlu1 %1972 }
 0x8db   : > { %v1975_v41 = vsel %vm1741_vm1, %v5385_v3, %v1973_v40 }
 0x8dc   : > { %v1976_v42 = vpack.c.bf16 %v1975_v41, %v1975_v41 }
 0x8de   : > { %3871 = vmatmul.mubr.bf16.vlgmr.msra.gmra.mxu0 %v1976_v42 }
 0x8df   : > { %3876 = vmatprep.mubr.msk.bf16.mxu0 %vm4771_vm0, %v4770_v63 }
 0x99e   : > { %v2082_v49 = vpop.f32.mrf.mxu0 }
 0x99f   : > { %v2083_v50 = vadd.f32 %v3668_v48, %v2082_v49 }
 0x9a0   : > { %v3872_v51 = vpop.f32.mrf.mxu0 }
 0x9a1   : > { %v2088_v25 = vpack.c.bf16 %v2083_v50, %v2083_v50 }
 0x9a2   : > { %v2085_v3 = vpop.f32.mrf.mxu0 }
 0x9a3   : > { %2230 = vmatmul.mubr.bf16.vlgmr.msra.gmra.mxu1 %v2088_v25 }
 0x9a4   : > { %v3873_v52 = vpop.f32.mrf.mxu0  ;;  %3882 = vmatprep.mubr.msk.bf16.mxu1 %vm4771_vm0, %v4770_v63 }
 0xa63   : > { %v2231_v57 = vpop.f32.mrf.mxu1 }
 0xa64   : > { %v2232_v61 = vadd.f32 %v2231_v57, %v2110_v54 }
 0xa65   : > { %v2233_v62 = vpop.f32.mrf.mxu1 }
 0xa66   : > { %v2240_v1 = vpack.c.bf16 %v2232_v61, %v2232_v61  ;;  %v2234_v2 = vadd.f32 %v2233_v62, %v2114_v56 }
 0xa67   : > { %v2235_v4 = vpop.f32.mrf.mxu1 }
 0xa68   : > { %v2246_v5 = vsel %vm1741_vm1, %v2240_v1, 0  ;;  %v2241_v6 = vpack.c.bf16 %v2234_v2, %v2234_v2  ;;  %2358 = vrot.lane.b32.xlu1 %v2240_v1, %s4772_s9 }
 0xa69   : > { %v2236_v7 = vpop.f32.mrf.mxu1  ;;  %3875 = vmatpush3.bf16.xpose.msra.mxu0 %v2246_v5 }
 0xa6a   : > { %v2312_v10 = vsel %vm1812_vm2, %v2241_v6, 0  ;;  %3886 = vmatprep.subr.bf16.mxu0 %v4770_v63 }
 0xa6b   : > { %3881 = vmatpush3.bf16.msra.mxu1 %v2312_v10 }
 0xa6c   : > { %2355 = vrot.lane.b32.xlu1 %v2239_v8, %s4772_s9  ;;  %3892 = vmatprep.subr.bf16.mxu1 %v4770_v63 }
 0xa70   : > { %3877 = vmatmul.mubr.msk.bf16.vlgmr.msra.gmra.mxu0 %vm1741_vm1, %v2239_v8 }
 0xa71   : > { %3888 = vmatprep.mubr.msk.bf16.mxu0 %vm4771_vm0, %v4770_v63 }
 0xada   : > { %v2359_v21 = vpop.permute.xlu1 %2358 }
 0xadb   : > { %v2364_v22 = vsel %vm1741_vm1, %v2359_v21, 0 }
 0xadc   : > { %3887 = vmatpush3.bf16.xpose.msra.mxu0 %v2364_v22 }
 0xadd   : > { %3898 = vmatprep.subr.bf16.mxu0 %v4770_v63 }
 0xade   : > { %v2356_v59 = vpop.permute.xlu1 %2355 }
 0xae3   : > { %3889 = vmatmul.mubr.msk.bf16.vlgmr.msra.gmra.mxu0 %vm1741_vm1, %v2356_v59 }
 0xae4   : > { %3914 = vmatprep.mubr.msk.bf16.mxu0 %vm4771_vm0, %v4770_v63 }
 0xb30   : > { %v2282_v23 = vpop.f32.mrf.mxu0 }
 0xb31   : > { %v2288_v26 = vmul.f32 0.125, %v2282_v23  ;;  %v4252_v23 = vld [vmem:[#allocation22 + $0x38] sm:$0xff]  }
 0xb32   : > { %v3878_v27 = vpop.f32.mrf.mxu0  ;;  %3899 = vmatpush3.bf16.msra.mxu0 %v4252_v23 }
 0xb33   : > { %v2295_v29 = vadd.f32 %v3694_v24, %v2288_v26  ;;  %3900 = vmatprep.subr.bf16.mxu0 %v4770_v63  ;;  %v4254_v26 = vld [vmem:[#allocation22 + $0x28] sm:$0xff]  }
 0xb34   : > { %v2285_v39 = vpop.f32.mrf.mxu0 }
 0xb35   : > { %v2296_v40 = vsel %vm1796_vm3, %v2295_v29, -inf  ;;  %v4255_v39 = vld [vmem:[#allocation22 + $0x20] sm:$0xff]  }
 0xb36   : > { %2297 = vmax.xlane.f32.xlu0 %v2296_v40  ;;  %v3879_v41 = vpop.f32.mrf.mxu0 }
 0xba3   : > { %v2400_v42 = vpop.f32.mrf.mxu0 }
 0xba4   : > { %v2406_v33 = vmul.f32 0.125, %v2400_v42  ;;  %v4256_v42 = vld [vmem:[#allocation22 + $0x18] sm:$0xff]  }
 0xba5   : > { %v3890_v47 = vpop.f32.mrf.mxu0 }
 0xba6   : > { %v2407_v48 = vadd.f32 %v3694_v24, %v2406_v33  ;;  %v4253_v24 = vld [vmem:[#allocation22 + $0x30] sm:$0xff]   ;;  %v4258_v47 = vld [vmem:[#allocation22 + $0x8] sm:$0xff]  }
 0xba7   : > { %v2403_v49 = vpop.f32.mrf.mxu0  ;;  %3901 = vmatpush3.bf16.msra.mxu0 %v4253_v24  ;;  %v4257_v33 = vld [vmem:[#allocation22 + $0x10] sm:$0xff]  }
 0xba8   : > { %v2408_v50 = vsel %vm1796_vm3, %v2407_v48, -inf  ;;  %3902 = vmatprep.subr.bf16.mxu0 %v4770_v63 }
 0xba9   : > { %2409 = vmax.xlane.f32.xlu1 %v2408_v50  ;;  %v3891_v51 = vpop.f32.mrf.mxu0 }
 0xbab   : > { %3903 = vmatpush3.bf16.msra.mxu0 %v4254_v26 }
 0xbac   : > { %3904 = vmatprep.subr.bf16.mxu0 %v4770_v63 }
 0xbaf   : > { %3905 = vmatpush3.bf16.msra.mxu0 %v4255_v39  ;;  %v2697_v39 = vld [vmem:[%s5627_s14] sm:$0x3] }
 0xbb0   : > { %3906 = vmatprep.subr.bf16.mxu0 %v4770_v63 }
 0xbb3   : > { %3907 = vmatpush3.bf16.msra.mxu0 %v4256_v42 }
 0xbb4   : > { %3908 = vmatprep.subr.bf16.mxu0 %v4770_v63 }
 0xbb7   : > { %3909 = vmatpush3.bf16.msra.mxu0 %v4257_v33 }
 0xbb8   : > { %3910 = vmatprep.subr.bf16.mxu0 %v4770_v63 }
 0xbbb   : > { %3911 = vmatpush3.bf16.msra.mxu0 %v4258_v47 }
 0xbbc   : > { %3912 = vmatprep.subr.bf16.mxu0 %v4770_v63 }
 0xbbf   : > { %v2298_v25 = vpop.xlane.xlu0 %2297 }
 0xbc0   : > { %v2299_v3 = vsub.f32 %v2295_v29, %v2298_v25 }
 0xbc2   : > { %v2300_v52 = vmul.f32 1.442695, %v2299_v3 }
 0xbc4   : > { %4290 = vpow2.f32 %v2300_v52 }
 0xbd1   : > { %v4291_v53 = vpop.eup %4290 }
 0xbd2   : > { %v2302_v54 = vsel %vm1796_vm3, %v4291_v53, 0.0 }
 0xbd3   : > { %2303 = vadd.xlane.f32.xlu0 %v2302_v54 }
 0xc32   : > { %v2410_v56 = vpop.xlane.xlu1 %2409 }
 0xc33   : > { %v2411_v57 = vsub.f32 %v2407_v48, %v2410_v56  ;;  %v4259_v48 = vld [vmem:[#allocation22] sm:$0xff]  }
 0xc34   : > { %3913 = vmatpush3.bf16.msra.mxu0 %v4259_v48 }
 0xc35   : > { %v2412_v61 = vmul.f32 1.442695, %v2411_v57  ;;  %2933 = vmatprep.subr.bf16.mxu0 %v5279_v55  ;;  %v3698_v55 = vld [vmem:[%s5728_s26] ss:$0 sm:$0xff]  ;;  %s1069_s26 = scalar_lea.vmem %s5732_s1, %s5477_s6 }
 0xc37   : > { %4292 = vpow2.f32 %v2412_v61 }
 0xc44   : > { %v4293_v62 = vpop.eup %4292 }
 0xc45   : > { %v2414_v1 = vsel %vm1796_vm3, %v4293_v62, 0.0 }
 0xc46   : > { %2415 = vadd.xlane.f32.xlu0 %v2414_v1 }
 0xc5c   : > { %v2304_v2 = vpop.xlane.xlu0 %2303  ;;  %2421 = vrot.lane.b32.xlu0 %v2241_v6, %s4772_s9 }
 0xc5d   : > { %4294 = vrcp.f32 %v2304_v2  ;;  %v2663_v2 = vld [vmem:[%s5731_s3] sm:$0x1]  ;;  %s3343_s3 = sshll.u32 %s1063_s19, 4  ;;  %s3344_s3 = int_to_ptr.vmem [resolvable:$true] %s3343_s3 }
 0xc5e   : > { %s4654_s1 = scalar_lea.vmem %s3344_s3, 16 }
 0xc5f   : > { %p4655_p9 = scmp.ne.s32.totalorder %s3344_s3, %s4654_s1 }
 0xc6a   : > { %v4295_v4 = vpop.eup %4294 }
 0xc6b   : > { %v2306_v5 = vmul.f32 %v4295_v4, %v4291_v53 }
 0xc6d   : > { %v2307_v7 = vpack.c.bf16 %v2306_v5, %v2306_v5 }
 0xc6f   : > { %3883 = vmatmul.mubr.msk.bf16.vlgmr.msra.gmra.mxu1 %vm1796_vm3, %v2307_v7 }
 0xc70   : > { %3894 = vmatprep.mubr.msk.bf16.mxu1 %vm4771_vm0, %v4770_v63 }
 0xccf   : > { %v2416_v8 = vpop.xlane.xlu0 %2415 }
 0xcd0   : > { %4296 = vrcp.f32 %v2416_v8  ;;  %v2841_v8 = vld [vmem:[%s5629_s16] sm:$0x3] }
 0xcd3   : > { %v2422_v10 = vpop.permute.xlu0 %2421 }
 0xcd4   : > { %v2427_v21 = vsel %vm1812_vm2, %v2422_v10, 0  ;;  %v2846_v10 = vrot.slane %v2841_v8, %v5282_v58 }
 0xcd5   : > { %3893 = vmatpush3.bf16.msra.mxu1 %v2427_v21  ;;  %v2850_v21 = vrot.slane %v2841_v8, %v5287_v60 }
 0xcd6   : > { %3918 = vmatprep.subr.mxu1 %v4770_v63 }
 0xcdd   : > { %v4297_v22 = vpop.eup %4296 }
 0xcde   : > { %v2418_v59 = vmul.f32 %v4297_v22, %v4293_v62  ;;  %v2662_v62 = vld [vmem:[%s5730_s17] sm:$0x1]  ;;  %s5735_s17 = sld [smem:[#allocation61_spill]] }
 0xce0   : > { %v2419_v6 = vpack.c.bf16 %v2418_v59, %v2418_v59 }
 0xce2   : > { %3895 = vmatmul.mubr.msk.bf16.vlgmr.msra.gmra.mxu1 %vm1796_vm3, %v2419_v6 }
 0xce3   : > { %3920 = vmatprep.mubr.msk.f32.mxu1 %vm4771_vm0, %v4770_v63 }
 0xd2f   : > { %v2348_v27 = vpop.f32.mrf.mxu1 }
 0xd31   : > { %v3884_v29 = vpop.f32.mrf.mxu1 }
 0xd33   : > { %v2351_v40 = vpop.f32.mrf.mxu1 }
 0xd34   : > { %v2782_v40 = vrot.slane %v2697_v39, %v5282_v58 }
 0xd35   : > { %v3885_v41 = vpop.f32.mrf.mxu1 }
 0xda2   : > { %v2463_v49 = vpop.f32.mrf.mxu1 }
 0xda3   : > { %2470 = vrot.lane.b32.xlu1 %v2463_v49, %s4772_s9 }
 0xda4   : > { %v3896_v50 = vpop.f32.mrf.mxu1 }
 0xda6   : > { %v2466_v51 = vpop.f32.mrf.mxu1 }
 0xda7   : > { %v2974_v51 = vld [vmem:[%s1069_s26] sm:$0x1]  ;;  %s4773_s26 = smov [#allocation23]  }
 0xda8   : > { %v3897_v25 = vpop.f32.mrf.mxu1  ;;  %s4658_s6 = sshll.u32 %s4773_s26, 4  ;;  %s4659_s6 = int_to_ptr.vmem [resolvable:$false] %s4658_s6 }
 0xda9   : > { %s4660_s28 = scalar_lea.vmem %s4659_s6, 32  ;;  %p4661_p0 = scmp.lt.s32.totalorder %s3344_s3, %s4659_s6 }
 0xdaa   : > { %p4662_p13 = scmp.lt.s32.totalorder %s4660_s28, %s4654_s1 }
 0xdac   : > { %p4663_p5 = por %p4662_p13, %p4661_p0 }
 0xe15   : > { %v2471_v3 = vpop.permute.xlu1 %2470 }
 0xe16   : > { %v2473_v52 = vsel %vm1741_vm1, %v2348_v27, %v2471_v3 }
 0xe17   : > { %v2474_v53 = vpack.c.bf16 %v2473_v52, %v2473_v52 }
 0xe19   : > { %3915 = vmatmul.mubr.bf16.vlgmr.msra.gmra.mxu0 %v2474_v53 }
 0xe1a   : > { %2934 = vmatpush1.bf16.msra.mxu0 %v5291_v9  ;;  %2965 = vmatprep.mubr.bf16.mxu0 %v4769_v0 }
 0xe1b   : > { %2935 = vmatprep.subr.bf16.mxu0 %v5293_v11 }
 0xe1e   : > { %2936 = vmatpush1.bf16.msra.mxu0 %v5296_v12 }
 0xe1f   : > { %2937 = vmatprep.subr.bf16.mxu0 %v5300_v13 }
 0xe22   : > { %2938 = vmatpush1.bf16.msra.mxu0 %v5303_v14  ;;  %v2587_v14 = vld [vmem:[%s1066_s11] sm:$0x1]  ;;  %s5734_s11 = sld [smem:[#allocation38_spill]] }
 0xe23   : > { %2939 = vmatprep.subr.bf16.mxu0 %v5306_v15 }
 0xe26   : > { %2940 = vmatpush1.bf16.msra.mxu0 %v5309_v16 }
 0xe27   : > { %2941 = vmatprep.subr.bf16.mxu0 %v5312_v17 }
 0xe28   : > { %p5738_p4 = scmp.ne.s32.totalorder %s5734_s11, 0 }
 0xe2a   : > { %2942 = vmatpush1.bf16.msra.mxu0 %v5315_v18  ;;  %v4262_v18 = vld [vmem:[#allocation16 + $0x34] ss:$8 sps:$4 sm:$0xff]   ;;  %p4656_p11 = pnand %p4655_p9, %p5738_p4 }
 0xe2b   : > { %2943 = vmatprep.subr.bf16.mxu0 %v5318_v19  ;;  %v4265_v19 = vld [vmem:[#allocation16 + $0x24] ss:$8 sps:$4 sm:$0xff]  }
 0xe2c   : > { %p4657_p12 = pneg %p4656_p11 }
 0xe2e   : > { %2944 = vmatpush1.bf16.msra.mxu0 %v5321_v20  ;;  %p4664_p7 = pnand %p4663_p5, %p4657_p12 }
 0xe2f   : > { %2945 = vmatprep.subr.bf16.mxu0 %v5326_v28  ;;  %v4263_v28 = vld [vmem:[#allocation16 + $0x20] ss:$8 sps:$4 sm:$0xff]  }
 0xe32   : > { %2946 = vmatpush1.bf16.msra.mxu0 %v5328_v30  ;;  %v4268_v30 = vld [vmem:[#allocation16 + $0x14] ss:$8 sps:$4 sm:$0xff]  }
 0xe33   : > { %2947 = vmatprep.subr.bf16.mxu0 %v5334_v32  ;;  %v4271_v32 = vld [vmem:[#allocation16 + $0x4] ss:$8 sps:$4 sm:$0xff]  }
 0xe36   : > { %2948 = vmatpush1.bf16.msra.mxu0 %v5338_v34  ;;  %v4269_v34 = vld [vmem:[#allocation16] ss:$8 sps:$4 sm:$0xff]  }
 0xe37   : > { %3941 = vmatprep.subr.bf16.mxu0 %v4770_v63 }
 0xed9   : > { %v2580_v9 = vpop.f32.mrf.mxu0 }
 0xeda   : > { %v2581_v11 = vadd.f32 %v3698_v55, %v2580_v9 }
 0xedb   : > { %v3916_v12 = vpop.f32.mrf.mxu0 }
 0xedc   : > { %v2586_v13 = vadd.f32 %v2581_v11, %v5331_v31  ;;  %v4266_v31 = vld [vmem:[#allocation16 + $0x10] ss:$8 sps:$4 sm:$0xff]  }
 0xedd   : > { %v2583_v15 = vpop.f32.mrf.mxu0 }
 0xede   : > { %3919 = vmatpush3.msra.mxu1 %v2586_v13 }
 0xedf   : > { %v3917_v16 = vpop.f32.mrf.mxu0  ;;  %3921 = vmatmul.mubr.msk.f32.vlgmr.msra.gmra.mxu1 %vm1796_vm3, %v2587_v14  ;;  %2784 = vmatprep.subr.bf16.mxu1 %v5252_v36 }
 0xee0   : > { %2785 = vmatpush1.bf16.msra.mxu1 %v5250_v35  ;;  %2816 = vmatprep.mubr.bf16.mxu1 %v4769_v0 }
 0xee1   : > { %2786 = vmatprep.subr.bf16.mxu1 %v5254_v37 }
 0xee4   : > { %2787 = vmatpush1.bf16.msra.mxu1 %v5258_v38 }
 0xee5   : > { %2788 = vmatprep.subr.bf16.mxu1 %v5267_v43 }
 0xee8   : > { %2789 = vmatpush1.bf16.msra.mxu1 %v5269_v44 }
 0xee9   : > { %2790 = vmatprep.subr.bf16.mxu1 %v5275_v46  ;;  %v4260_v46 = vld [vmem:[#allocation16 + $0x30] ss:$8 sps:$4 sm:$0xff]  }
 0xeec   : > { %2791 = vmatpush1.bf16.msra.mxu1 %v5273_v45  ;;  %v2661_v45 = vld [vmem:[%s5217_s23] sm:$0xff] }
 0xeed   : > { %2792 = vmatprep.subr.bf16.mxu1 %v4262_v18  ;;  %v2824_v20 = vpack.c.bf16 %v2661_v45, %v2661_v45 }
 0xeef   : > { %2966 = vmatmul.mubr.bf16.vlgmr.msra.gmra.mxu0 %v2824_v20 }
 0xef0   : > { %2793 = vmatpush1.bf16.msra.mxu1 %v4260_v46  ;;  %3943 = vmatprep.mubr.msk.bf16.mxu0 %vm4771_vm0, %v4770_v63 }
 0xef1   : > { %2794 = vmatprep.subr.bf16.mxu1 %v4265_v19 }
 0xef4   : > { %2795 = vmatpush1.bf16.msra.mxu1 %v4263_v28 }
 0xef5   : > { %2796 = vmatprep.subr.bf16.mxu1 %v4268_v30 }
 0xef8   : > { %2797 = vmatpush1.bf16.msra.mxu1 %v4266_v31 }
 0xef9   : > { %2798 = vmatprep.subr.bf16.mxu1 %v4271_v32 }
 0xefc   : > { %2799 = vmatpush1.bf16.msra.mxu1 %v4269_v34 }
 0xefd   : > { %3923 = vmatprep.subr.bf16.mxu1 %v4770_v63 }
 0xf9f   : > { %v5497_v17 = vpop.f32.mrf.mxu1 }
 0xfa0   : > { %v2665_v35 = vsel %vm2664_vm4, %v5497_v17, 0.0 }
 0xfa1   : > { %2666 = vadd.xlane.f32.xlu1 %v2665_v35  ;;  %v3922_v0 = vpop.f32.mrf.mxu1 }
 0xfaf   : > { %v2967_v22 = vpop.f32.mrf.mxu0 }
 0xfb0   : > { %v2968_v59 = vadd.f32 %v2967_v22, %v2846_v10  ;;  %v4272_v10 = vld [vmem:[#allocation19 + $0x38] sm:$0xff]   ;;  %v4274_v22 = vld [vmem:[#allocation19 + $0x28] sm:$0xff]  }
 0xfb1   : > { %v2969_v6 = vpop.f32.mrf.mxu0 }
 0xfb2   : > { %v2976_v23 = vpack.c.bf16 %v2968_v59, %v2968_v59  ;;  %v2970_v24 = vadd.f32 %v2969_v6, %v2850_v21  ;;  %v4273_v21 = vld [vmem:[#allocation19 + $0x30] sm:$0xff]   ;;  %v4275_v59 = vld [vmem:[#allocation19 + $0x20] sm:$0xff]   ;;  %v4276_v6 = vld [vmem:[#allocation19 + $0x18] sm:$0xff]  }
 0xfb3   : > { %v2971_v26 = vpop.f32.mrf.mxu0 }
 0xfb4   : > { %v2982_v27 = vsel %vm1741_vm1, %v2976_v23, 0  ;;  %v5526_v41 = vpack.c.bf16 %v2970_v24, %v2970_v24  ;;  %v4278_v24 = vld [vmem:[#allocation19 + $0x8] sm:$0xff]   ;;  %v4279_v26 = vld [vmem:[#allocation19] sm:$0xff]  }
 0xfb5   : > { %v2972_v29 = vpop.f32.mrf.mxu0 }
 0xfb6   : > { %v3043_v49 = vsel %vm1812_vm2, %v5526_v41, 0 }
0x102a   : > { %v2667_v36 = vpop.xlane.xlu1 %2666 }
0x102b   : > { %v2668_v37 = vmul.f32 0.0078125, %v2667_v36 }
0x102d   : > { %v2669_v38 = vsub.f32 %v5497_v17, %v2668_v37 }
0x102f   : > { %v2670_v43 = vmul.f32 %v2669_v38, %v2669_v38 }
0x1031   : > { %v2671_v44 = vsel %vm2664_vm4, %v2670_v43, 0.0 }
0x1032   : > { %2672 = vadd.xlane.f32.xlu0 %v2671_v44 }
0x10bb   : > { %v2673_v54 = vpop.xlane.xlu0 %2672 }
0x10bc   : > { %v2674_v56 = vmul.f32 0.0078125, %v2673_v54 }
0x10be   : > { %v2675_v57 = vadd.f32 1e-08, %v2674_v56 }
0x10c0   : > { %4298 = vrsqrt.f32 %v2675_v57 }
0x10cd   : > { %v4299_v61 = vpop.eup %4298 }
0x10ce   : > { %v2677_v1 = vmul.f32 %v4299_v61, %v2669_v38 }
0x10d0   : > { %v2678_v4 = vmul.f32 %v2677_v1, %v2662_v62 }
0x10d2   : > { %v2679_v5 = vadd.f32 %v2678_v4, %v2663_v2 }
0x10d4   : > { %v2680_v7 = vpack.c.bf16 %v2679_v5, %v2679_v5 }
0x10d6   : > { %2817 = vmatmul.mubr.bf16.vlgmr.msra.gmra.mxu1 %v2680_v7 }
0x10d7   : > { %3925 = vmatprep.mubr.msk.bf16.mxu1 %vm4771_vm0, %v4770_v63  ;;  %3924 = vmatpush3.bf16.xpose.msra.mxu1 %v2982_v27 }
0x10d8   : > { %3929 = vmatprep.subr.bf16.mxu1 %v4770_v63 }
0x1196   : > { %v2818_v60 = vpop.f32.mrf.mxu1 }
0x1197   : > { %v2819_v42 = vadd.f32 %v2818_v60, %v2782_v40 }
0x1198   : > { %v2820_v33 = vpop.f32.mrf.mxu1 }
0x1199   : > { %v2975_v47 = vpack.c.bf16 %v2819_v42, %v2819_v42  ;;  %v3222_v33 = vld [vmem:[%s5631_s18] sm:$0x1] }
0x119a   : > { %v2821_v48 = vpop.f32.mrf.mxu1 }
0x119b   : > { %3926 = vmatmul.mubr.msk.bf16.vlgmr.msra.gmra.mxu1 %vm1741_vm1, %v2975_v47 }
0x119c   : > { %3930 = vmatpush3.bf16.msra.mxu1 %v3043_v49  ;;  %v2822_v50 = vpop.f32.mrf.mxu1  ;;  %3931 = vmatprep.mubr.msk.bf16.mxu1 %vm4771_vm0, %v4770_v63 }
0x119d   : > { %3935 = vmatprep.subr.bf16.mxu1 %v4770_v63 }
0x125b   : > { %v3018_v58 = vpop.f32.mrf.mxu1 }
0x125c   : > { %v3024_v25 = vmul.f32 0.125, %v3018_v58 }
0x125d   : > { %v3927_v3 = vpop.f32.mrf.mxu1 }
0x125e   : > { %v3025_v52 = vadd.f32 %v3024_v25, %v2974_v51 }
0x125f   : > { %v3021_v53 = vpop.f32.mrf.mxu1 }
0x1260   : > { %v3027_v55 = vsel %vm3026_vm5, %v3025_v52, -inf }
0x1261   : > { %3028 = vmax.xlane.f32.xlu0 %v3027_v55  ;;  %v3928_v9 = vpop.f32.mrf.mxu1 }
0x1277   : > { %3089 = vrot.lane.b32.xlu0 %v2976_v23, %s4772_s9  ;;  %v4277_v23 = vld [vmem:[#allocation19 + $0x10] sm:$0xff]  }
0x12ea   : > { %v3029_v11 = vpop.xlane.xlu0 %3028 }
0x12eb   : > { %v3030_v12 = vsub.f32 %v3025_v52, %v3029_v11 }
0x12ed   : > { %v3031_v13 = vmul.f32 1.442695, %v3030_v12 }
0x12ee   : > { %v3090_v36 = vpop.permute.xlu0 %3089 }
0x12ef   : > { %4300 = vpow2.f32 %v3031_v13  ;;  %v3095_v38 = vsel %vm1741_vm1, %v3090_v36, 0  ;;  %v3311_v13 = vld [vmem:[%s5733_s5] sm:$0x1] }
0x12fc   : > { %v4301_v14 = vpop.eup %4300 }
0x12fd   : > { %v3033_v15 = vsel %vm3026_vm5, %v4301_v14, 0.0 }
0x12fe   : > { %3034 = vadd.xlane.f32.xlu1 %v3033_v15  ;;  %v3312_v15 = vld [vmem:[%s5735_s17] sm:$0x1] }
0x130f   : > { %3086 = vrot.lane.b32.xlu1 %v2975_v47, %s4772_s9 }
0x1387   : > { %v3035_v16 = vpop.xlane.xlu1 %3034 }
0x1388   : > { %4302 = vrcp.f32 %v3035_v16 }
0x138b   : > { %v3087_v43 = vpop.permute.xlu1 %3086 }
0x1395   : > { %v4303_v35 = vpop.eup %4302 }
0x1396   : > { %v3037_v0 = vmul.f32 %v4303_v35, %v4301_v14 }
0x1398   : > { %v3038_v37 = vpack.c.bf16 %v3037_v0, %v3037_v0 }
0x139a   : > { %3932 = vmatmul.mubr.msk.bf16.vlgmr.msra.gmra.mxu1 %vm1796_vm3, %v3038_v37 }
0x139b   : > { %3936 = vmatpush3.bf16.xpose.msra.mxu1 %v3095_v38  ;;  %3937 = vmatprep.mubr.msk.bf16.mxu1 %vm4771_vm0, %v4770_v63 }
0x139c   : > { %3947 = vmatprep.subr.bf16.mxu1 %v4770_v63 }
0x13a2   : > { %3938 = vmatmul.mubr.msk.bf16.vlgmr.msra.gmra.mxu1 %vm1741_vm1, %v3087_v43 }
0x13a3   : > { %3963 = vmatprep.mubr.msk.bf16.mxu1 %vm4771_vm0, %v4770_v63  ;;  %3948 = vmatpush3.bf16.msra.mxu1 %v4272_v10 }
0x13a4   : > { %3949 = vmatprep.subr.bf16.mxu1 %v4770_v63 }
0x13a7   : > { %3950 = vmatpush3.bf16.msra.mxu1 %v4273_v21 }
0x13a8   : > { %3951 = vmatprep.subr.bf16.mxu1 %v4770_v63 }
0x13ab   : > { %3952 = vmatpush3.bf16.msra.mxu1 %v4274_v22 }
0x13ac   : > { %3953 = vmatprep.subr.bf16.mxu1 %v4770_v63 }
0x13af   : > { %3954 = vmatpush3.bf16.msra.mxu1 %v4275_v59 }
0x13b0   : > { %3955 = vmatprep.subr.bf16.mxu1 %v4770_v63 }
0x13b3   : > { %3956 = vmatpush3.bf16.msra.mxu1 %v4276_v6 }
0x13b4   : > { %3957 = vmatprep.subr.bf16.mxu1 %v4770_v63 }
0x13b7   : > { %3958 = vmatpush3.bf16.msra.mxu1 %v4277_v23 }
0x13b8   : > { %3959 = vmatprep.subr.bf16.mxu1 %v4770_v63 }
0x13bb   : > { %3960 = vmatpush3.bf16.msra.mxu1 %v4278_v24 }
0x13bc   : > { %3961 = vmatprep.subr.bf16.mxu1 %v4770_v63 }
0x13bf   : > { %3962 = vmatpush3.bf16.msra.mxu1 %v4279_v26 }
0x145a   : > { %v3079_v44 = vpop.f32.mrf.mxu1 }
0x145c   : > { %v3933_v46 = vpop.f32.mrf.mxu1 }
0x145e   : > { %v3082_v18 = vpop.f32.mrf.mxu1 }
0x1460   : > { %v3934_v19 = vpop.f32.mrf.mxu1 }
0x1462   : > { %v3131_v45 = vpop.f32.mrf.mxu1 }
0x1463   : > { %v3137_v20 = vmul.f32 0.125, %v3131_v45 }
0x1464   : > { %v3939_v28 = vpop.f32.mrf.mxu1 }
0x1465   : > { %v3138_v30 = vadd.f32 %v3137_v20, %v2974_v51 }
0x1466   : > { %v3134_v31 = vpop.f32.mrf.mxu1 }
0x1467   : > { %v3139_v32 = vsel %vm3026_vm5, %v3138_v30, -inf }
0x1468   : > { %3140 = vmax.xlane.f32.xlu1 %v3139_v32  ;;  %v3940_v34 = vpop.f32.mrf.mxu1 }
0x14f1   : > { %v3141_v54 = vpop.xlane.xlu1 %3140 }
0x14f2   : > { %v3142_v56 = vsub.f32 %v3138_v30, %v3141_v54 }
0x14f4   : > { %v3143_v57 = vmul.f32 1.442695, %v3142_v56 }
0x14f6   : > { %4304 = vpow2.f32 %v3143_v57 }
0x1503   : > { %v4305_v61 = vpop.eup %4304 }
0x1504   : > { %v3145_v62 = vsel %vm3026_vm5, %v4305_v61, 0.0 }
0x1505   : > { %3146 = vadd.xlane.f32.xlu0 %v3145_v62 }
0x151b   : > { %3152 = vrot.lane.b32.xlu0 %v5526_v41, %s4772_s9 }
0x158e   : > { %v3147_v1 = vpop.xlane.xlu0 %3146 }
0x158f   : > { %4306 = vrcp.f32 %v3147_v1 }
0x1592   : > { %v3153_v2 = vpop.permute.xlu0 %3152 }
0x1593   : > { %v3158_v4 = vsel %vm1812_vm2, %v3153_v2, 0 }
0x1594   : > { %3942 = vmatpush3.bf16.msra.mxu0 %v3158_v4 }
0x159c   : > { %v4307_v5 = vpop.eup %4306 }
0x159d   : > { %v3149_v7 = vmul.f32 %v4307_v5, %v4305_v61 }
0x159f   : > { %v3150_v8 = vpack.c.bf16 %v3149_v7, %v3149_v7 }
0x15a1   : > { %3944 = vmatmul.mubr.msk.bf16.vlgmr.msra.gmra.mxu0 %vm1796_vm3, %v3150_v8 }
0x1661   : > { %v3194_v27 = vpop.f32.mrf.mxu0 }
0x1662   : > { %3201 = vrot.lane.b32.xlu1 %v3194_v27, %s4772_s9 }
0x1663   : > { %v3945_v29 = vpop.f32.mrf.mxu0 }
0x1665   : > { %v3197_v39 = vpop.f32.mrf.mxu0 }
0x1667   : > { %v3946_v40 = vpop.f32.mrf.mxu0 }
0x16d4   : > { %v3202_v60 = vpop.permute.xlu1 %3201 }
0x16d5   : > { %v3204_v41 = vsel %vm1741_vm1, %v3079_v44, %v3202_v60 }
0x16d6   : > { %v3205_v42 = vpack.c.bf16 %v3204_v41, %v3204_v41 }
0x16d8   : > { %3964 = vmatmul.mubr.bf16.vlgmr.msra.gmra.mxu1 %v3205_v42 }
0x1798   : > { %v3305_v47 = vpop.f32.mrf.mxu1 }
0x1799   : > { %v3306_v48 = vadd.f32 %v3305_v47, %v3222_v33 }
0x179a   : > { %v3965_v63 = vpop.f32.mrf.mxu1 }
0x179b   : > { %v3313_v49 = vsel %vm2664_vm4, %v3306_v48, 0.0 }
0x179c   : > { %3314 = vadd.xlane.f32.xlu1 %v3313_v49  ;;  %v3308_v50 = vpop.f32.mrf.mxu1 }
0x179e   : > { %v3966_v58 = vpop.f32.mrf.mxu1 }
0x1825   : > { %v3315_v51 = vpop.xlane.xlu1 %3314 }
0x1826   : > { %v3316_v25 = vmul.f32 0.0078125, %v3315_v51 }
0x1828   : > { %v3317_v3 = vsub.f32 %v3306_v48, %v3316_v25 }
0x182a   : > { %v3318_v52 = vmul.f32 %v3317_v3, %v3317_v3 }
0x182c   : > { %v3319_v53 = vsel %vm2664_vm4, %v3318_v52, 0.0 }
0x182d   : > { %3320 = vadd.xlane.f32.xlu0 %v3319_v53 }
0x18b6   : > { %v3321_v55 = vpop.xlane.xlu0 %3320 }
0x18b7   : > { %v3322_v9 = vmul.f32 0.0078125, %v3321_v55 }
0x18b9   : > { %v3323_v11 = vadd.f32 1e-08, %v3322_v9 }
0x18bb   : > { %4308 = vrsqrt.f32 %v3323_v11 }
0x18c8   : > { %v4309_v12 = vpop.eup %4308 }
0x18c9   : > { %v3325_v14 = vmul.f32 %v4309_v12, %v3317_v3 }
0x18cb   : > { %v3326_v16 = vmul.f32 %v3325_v14, %v3311_v13 }
0x18cd   : > { %v3327_v35 = vadd.f32 %v3326_v16, %v3312_v15 }
0x18cf   : > { %v3328_v0 = vadd.f32 %v3327_v35, %v5497_v17 }
0x18d1   : > { %3329 = vst [vmem:[%s1063_s19] sm:$0x1] %v3328_v0 }
0x18d2   : > { %4667 = shalt.err (!%p4664_p7)
}
0x18d3   : > { %s4668_s25 = scalar_lea.hbm %s3341_s0, 16  ;;  %s4672_s13 = scalar_lea.hbm %s5737_s15, 32 }
0x18d4   : > { %p4669_p10 = scmp.ne.s32.totalorder %s3341_s0, %s4668_s25  ;;  %p4673_p6 = scmp.lt.s32.totalorder %s3341_s0, %s5737_s15 }
0x18d5   : > { %p4674_p2 = scmp.lt.s32.totalorder %s4672_s13, %s4668_s25 }
0x18d6   : > { %p4670_p1 = pnand %p4669_p10, %p5738_p4 }
0x18d7   : > { %p4675_p8 = por %p4674_p2, %p4673_p6 }
0x18d8   : > { %p4671_p3 = pneg %p4670_p1 }
0x18da   : > { %p4676_p9 = pnand %p4675_p8, %p4671_p3 }
0x18dc   : > { %4679 = shalt.err (!%p4676_p9)
}
0x18dd   : > { %4013 = dma.vmem_to_hbm [thread:$0]  (%p5738_p4), %s3344_s3, 16, %s3341_s0, %s3331_s27  }
0x18de PF: > { %s5739_s8 = sld [smem:[#allocation34_spill]]  ;;  %p5742_p12 = scmp.ge.s32.totalorder %s4750_s30, 2 }
0x18df   : > { %s5740_s17 = sld [smem:[#allocation39_spill]] }
0x18e4   : > { %s3355_s2 = sand.u32 1, %s5739_s8  }
0x18e5   : > { %p5741_p11 = scmp.ne.s32.totalorder %s5740_s17, 0  ;;  %s3356_s19 = scalar_lea.sflag [#allocation4], %s3355_s2 }
0x18e7   : > { %p4057_p0 = pnand %p5742_p12, %p5741_p11 }
0x18e9   : > { %p4058_p13 = pneg %p4057_p0 }
0x18eb   : > { %4733 = dma.done.wait (%p4058_p13), %s3356_s19, 16  }
0x18ec   : > { %4735 = vsyncadd (%p4058_p13), %s3356_s19, 4294967280  ;;  %s5743_s30 = sld [smem:[#allocation36_spill]]  ;;  %s5746_s7 = smov %s4742_s4 }
0x18ed   : > { %s5744_s10 = sld [smem:[#allocation35_spill]] }
0x18ee   : > { %s5745_s8 = sld [smem:[#allocation37_spill]] }
0x18f2   : > { %p50_p5 = scmp.ge.s32.totalorder %s5743_s30, 4  }
0x18f3   : > { %s5747_s4 = smov %s5744_s10 }
0x18f4   :  { %52 = sbr.rel (!%p50_p5) target bundleno = 37 (0x25), region = 245 }
0x18f9   :  { %3360 = vsyncpa [#allocation3], 1 }
0x18fa   :  { %3362 = vsyncpa [#allocation3 + $0x1], 1 }
0x18fb   :  { %3363 = vsyncpa [#allocation6], 1 }
0x18fc   :  { %3365 = vsyncpa [#allocation6 + $0x1], 1 }
0x18fd   :  { %3366 = vsyncpa [#allocation9], 1 }
0x18fe   :  { %3368 = vsyncpa [#allocation9 + $0x1], 1 }
0x18ff   :  { %3369 = vsyncpa [#allocation12], 1 }
0x1900   :  { %3370 = vsyncpa [#allocation15], 1 }
0x1901   :  { %3371 = vsyncpa [#allocation18], 1 }
0x1902   :  { %3372 = vsyncpa [#allocation21], 1 }
0x1903   :  { %3373 = vsyncpa [#allocation4], 1 }
0x1904   :  { %3375 = vsyncpa [#allocation4 + $0x1], 1 }

</bundles_post_ra>
